<compile_context>
chip_gen: v6e
topology: v6e:2x2x1
jax: 0.10.0
libtpu: 0.0.40
codegen_flags: <defaults>
</compile_context>

<pallas_src>
import jax
import jax.numpy as jnp
from jax.experimental import pallas as pl
from jax.experimental.pallas import tpu as pltpu

IN_DIM, H1, H2, OUT_DIM = 2870, 256, 128, 50
OUT_PAD = 128          # 50 logits lane-padded to one full lane width
BN_EPS = 1e-5
NEG_BIG = -1e30        # finite "minus infinity" for masked softmax lanes


def net_kernel(x_ref, w1_ref, g1_ref, be1_ref,
               w2_ref, g2_ref, be2_ref,
               w3_ref, b3_ref, o_ref):
    """Whole forward pass in one program; all operands already VMEM-resident."""

    def bn_relu(h, g, be):
        # Training-mode BatchNorm1d: batch statistics, biased variance.
        # Two-pass variance E[(h-mu)^2] for numerical robustness.
        inv_b = 1.0 / h.shape[0]
        mu = jnp.sum(h, axis=0, keepdims=True) * inv_b
        d = h - mu
        var = jnp.sum(d * d, axis=0, keepdims=True) * inv_b
        scale = g * jax.lax.rsqrt(var + BN_EPS)
        return jnp.maximum(d * scale + be, 0.0)

    # ---- fc1 (bias cancels exactly under batch-stat BN) + BN1 + ReLU ----
    x = x_ref[...].astype(jnp.bfloat16)
    h1 = jnp.dot(x, w1_ref[...], preferred_element_type=jnp.float32)
    h1 = bn_relu(h1, g1_ref[...], be1_ref[...])

    # ---- fc2 (bias cancels under batch-stat BN) + BN2 + ReLU ----
    h2 = jnp.dot(h1.astype(jnp.bfloat16), w2_ref[...],
                 preferred_element_type=jnp.float32)
    h2 = bn_relu(h2, g2_ref[...], be2_ref[...])

    # ---- fc3 (lane-padded 50 -> 128) + softmax over the real 50 lanes ----
    logits = jnp.dot(h2.astype(jnp.bfloat16), w3_ref[...],
                     preferred_element_type=jnp.float32) + b3_ref[...]
    lane = jax.lax.broadcasted_iota(jnp.int32, logits.shape, 1)
    logits = jnp.where(lane < OUT_DIM, logits, NEG_BIG)
    m = jnp.max(logits, axis=-1, keepdims=True)
    e = jnp.exp(logits - m)                      # padded lanes underflow to 0
    denom = jnp.sum(e, axis=-1, keepdims=True)
    # approx=True reciprocal would exceed the tight accuracy budget here.
    o_ref[...] = e * pl.reciprocal(denom, approx=False)


def _vmem_budget_bytes(batch):
    f32, bf16 = 4, 2
    operands = (batch * IN_DIM * f32       # x (f32 in, cast in-kernel)
                + IN_DIM * H1 * bf16       # w1 (dominant stream)
                + 2 * H1 * f32             # gamma1, beta1
                + H1 * H2 * bf16           # w2
                + 2 * H2 * f32             # gamma2, beta2
                + H2 * OUT_PAD * bf16      # w3 (lane-padded)
                + OUT_PAD * f32            # b3 (lane-padded)
                + batch * OUT_PAD * f32)   # output
    # Headroom for in-kernel intermediates and internal layout padding.
    return int(operands + (8 << 20))


def net_forward(x, prepared):
    (w1b, g1, be1, w2b, g2, be2, w3p, b3p) = prepared
    B = x.shape[0]
    vmem_whole = pl.BlockSpec(memory_space=pltpu.MemorySpace.VMEM)

    out_padded = pl.pallas_call(
        net_kernel,
        out_shape=jax.ShapeDtypeStruct((B, OUT_PAD), jnp.float32),
        in_specs=[vmem_whole] * 9,           # whole arrays, no grid, no padding
        out_specs=vmem_whole,
        compiler_params=pltpu.CompilerParams(
            vmem_limit_bytes=_vmem_budget_bytes(B)),
    )(x, w1b, g1, be1, w2b, g2, be2, w3p, b3p)
    return out_padded[:, :OUT_DIM]


def init_params(key):
    """Deterministic init mimicking nn.Linear default (U[-1/sqrt(fan_in), +])."""
    ks = jax.random.split(key, 6)

    def linear(kw, kb, fan_in, fan_out):
        bound = 1.0 / jnp.sqrt(fan_in)
        w = jax.random.uniform(kw, (fan_in, fan_out), jnp.float32, -bound, bound)
        b = jax.random.uniform(kb, (1, fan_out), jnp.float32, -bound, bound)
        return w, b

    w1, b1 = linear(ks[0], ks[1], IN_DIM, H1)
    w2, b2 = linear(ks[2], ks[3], H1, H2)
    w3, b3 = linear(ks[4], ks[5], H2, OUT_DIM)
    g1, be1 = jnp.ones((1, H1), jnp.float32), jnp.zeros((1, H1), jnp.float32)
    g2, be2 = jnp.ones((1, H2), jnp.float32), jnp.zeros((1, H2), jnp.float32)
    return (w1, b1, g1, be1, w2, b2, g2, be2, w3, b3)


def prepare_params(params):
    """One-time kernel-layout prep: bf16 weights (no K padding), fc3 lane
    padding 50 -> 128, drop b1/b2 (cancel under batch-statistic BatchNorm)."""
    (w1, _b1, g1, be1, w2, _b2, g2, be2, w3, b3) = params
    w1b = w1.astype(jnp.bfloat16)
    w2b = w2.astype(jnp.bfloat16)
    w3p = jnp.zeros((H2, OUT_PAD), jnp.bfloat16).at[:, :OUT_DIM].set(
        w3.astype(jnp.bfloat16))
    b3p = jnp.zeros((1, OUT_PAD), jnp.float32).at[:, :OUT_DIM].set(b3)
    return (w1b, g1, be1, w2b, g2, be2, w3p, b3p)


def reference_forward(x, params):
    """Plain-JAX reference (same bf16 matmul inputs, PyTorch-style BN math)."""
    (w1, b1, g1, be1, w2, b2, g2, be2, w3, b3) = params
    bf = jnp.bfloat16

    def bn(h, g, be):
        mu = jnp.mean(h, axis=0, keepdims=True)
        var = jnp.mean((h - mu) ** 2, axis=0, keepdims=True)
        return (h - mu) * jax.lax.rsqrt(var + BN_EPS) * g + be

    h = jnp.dot(x.astype(bf), w1.astype(bf),
                preferred_element_type=jnp.float32) + b1
    h = jnp.maximum(bn(h, g1, be1), 0.0)
    h = jnp.dot(h.astype(bf), w2.astype(bf),
                preferred_element_type=jnp.float32) + b2
    h = jnp.maximum(bn(h, g2, be2), 0.0)
    h = jnp.dot(h.astype(bf), w3.astype(bf),
                preferred_element_type=jnp.float32) + b3
    return jax.nn.softmax(h, axis=-1)


if __name__ == "__main__":
    key = jax.random.PRNGKey(0)
    k_param, k_x = jax.random.split(key)
    params = init_params(k_param)
    prepared = prepare_params(params)

    B = 8
    x = jax.random.normal(k_x, (B, IN_DIM), jnp.float32)

    out = jax.block_until_ready(net_forward(x, prepared))
    ref = reference_forward(x, params)

    assert out.shape == (B, OUT_DIM)
    assert jnp.allclose(jnp.sum(out, axis=-1), 1.0, atol=1e-4)
    assert jnp.allclose(out, ref, atol=2e-4, rtol=2e-3), float(
        jnp.max(jnp.abs(out - ref)))
    print("KERNEL_OK")
</pallas_src>

<mosaic_0001>
module attributes {stable_mosaic.version = 11 : i64} {
  func.func @net_kernel(%arg0: memref<8x2870xf32, #tpu.memory_space<vmem>>, %arg1: memref<2870x256xbf16, #tpu.memory_space<vmem>>, %arg2: memref<1x256xf32, #tpu.memory_space<vmem>>, %arg3: memref<1x256xf32, #tpu.memory_space<vmem>>, %arg4: memref<256x128xbf16, #tpu.memory_space<vmem>>, %arg5: memref<1x128xf32, #tpu.memory_space<vmem>>, %arg6: memref<1x128xf32, #tpu.memory_space<vmem>>, %arg7: memref<128x128xbf16, #tpu.memory_space<vmem>>, %arg8: memref<1x128xf32, #tpu.memory_space<vmem>>, %arg9: memref<8x128xf32, #tpu.memory_space<vmem>>) attributes {dimension_semantics = [], scalar_prefetch = 0 : i64, scratch_operands = 0 : i64, tpu.core_type = #tpu.core_type<tc>} {
    %c0 = arith.constant 0 : index
    %c0_0 = arith.constant 0 : index
    %0 = vector.load %arg0[%c0, %c0_0] : memref<8x2870xf32, #tpu.memory_space<vmem>>, vector<8x2870xf32>
    %1 = arith.truncf %0 : vector<8x2870xf32> to vector<8x2870xbf16>
    %c0_1 = arith.constant 0 : index
    %c0_2 = arith.constant 0 : index
    %2 = vector.load %arg1[%c0_1, %c0_2] : memref<2870x256xbf16, #tpu.memory_space<vmem>>, vector<2870x256xbf16>
    %cst = arith.constant dense<0.000000e+00> : vector<8x256xf32>
    %3 = tpu.matmul %1, %2, %cst {dimension_numbers = #tpu.dot_dimension_numbers<[1], [0], [0], [1], [0, 0, 1, 1], [], []>} : vector<8x2870xbf16>, vector<2870x256xbf16>, vector<8x256xf32> -> vector<8x256xf32>
    %c0_3 = arith.constant 0 : index
    %c0_4 = arith.constant 0 : index
    %4 = vector.load %arg2[%c0_3, %c0_4] : memref<1x256xf32, #tpu.memory_space<vmem>>, vector<1x256xf32>
    %c0_5 = arith.constant 0 : index
    %c0_6 = arith.constant 0 : index
    %5 = vector.load %arg3[%c0_5, %c0_6] : memref<1x256xf32, #tpu.memory_space<vmem>>, vector<1x256xf32>
    %cst_7 = arith.constant dense<0.000000e+00> : vector<256xf32>
    %6 = vector.multi_reduction <add>, %3, %cst_7 [0] : vector<8x256xf32> to vector<256xf32>
    %7 = vector.shape_cast %6 : vector<256xf32> to vector<1x256xf32>
    %cst_8 = arith.constant 1.250000e-01 : f32
    %8 = vector.broadcast %cst_8 : f32 to vector<1x256xf32>
    %9 = arith.mulf %7, %8 : vector<1x256xf32>
    %10 = vector.broadcast %9 : vector<1x256xf32> to vector<8x256xf32>
    %11 = arith.subf %3, %10 : vector<8x256xf32>
    %12 = arith.mulf %11, %11 : vector<8x256xf32>
    %cst_9 = arith.constant dense<0.000000e+00> : vector<256xf32>
    %13 = vector.multi_reduction <add>, %12, %cst_9 [0] : vector<8x256xf32> to vector<256xf32>
    %14 = vector.shape_cast %13 : vector<256xf32> to vector<1x256xf32>
    %cst_10 = arith.constant 1.250000e-01 : f32
    %15 = vector.broadcast %cst_10 : f32 to vector<1x256xf32>
    %16 = arith.mulf %14, %15 : vector<1x256xf32>
    %cst_11 = arith.constant 9.99999974E-6 : f32
    %17 = vector.broadcast %cst_11 : f32 to vector<1x256xf32>
    %18 = arith.addf %16, %17 : vector<1x256xf32>
    %19 = math.rsqrt %18 : vector<1x256xf32>
    %20 = arith.mulf %4, %19 : vector<1x256xf32>
    %21 = vector.broadcast %20 : vector<1x256xf32> to vector<8x256xf32>
    %22 = arith.mulf %11, %21 : vector<8x256xf32>
    %23 = vector.broadcast %5 : vector<1x256xf32> to vector<8x256xf32>
    %24 = arith.addf %22, %23 : vector<8x256xf32>
    %cst_12 = arith.constant 0.000000e+00 : f32
    %25 = vector.broadcast %cst_12 : f32 to vector<8x256xf32>
    %26 = arith.maximumf %24, %25 : vector<8x256xf32>
    %27 = arith.truncf %26 : vector<8x256xf32> to vector<8x256xbf16>
    %c0_13 = arith.constant 0 : index
    %c0_14 = arith.constant 0 : index
    %28 = vector.load %arg4[%c0_13, %c0_14] : memref<256x128xbf16, #tpu.memory_space<vmem>>, vector<256x128xbf16>
    %cst_15 = arith.constant dense<0.000000e+00> : vector<8x128xf32>
    %29 = tpu.matmul %27, %28, %cst_15 {dimension_numbers = #tpu.dot_dimension_numbers<[1], [0], [0], [1], [0, 0, 1, 1], [], []>} : vector<8x256xbf16>, vector<256x128xbf16>, vector<8x128xf32> -> vector<8x128xf32>
    %c0_16 = arith.constant 0 : index
    %c0_17 = arith.constant 0 : index
    %30 = vector.load %arg5[%c0_16, %c0_17] : memref<1x128xf32, #tpu.memory_space<vmem>>, vector<1x128xf32>
    %c0_18 = arith.constant 0 : index
    %c0_19 = arith.constant 0 : index
    %31 = vector.load %arg6[%c0_18, %c0_19] : memref<1x128xf32, #tpu.memory_space<vmem>>, vector<1x128xf32>
    %cst_20 = arith.constant dense<0.000000e+00> : vector<128xf32>
    %32 = vector.multi_reduction <add>, %29, %cst_20 [0] : vector<8x128xf32> to vector<128xf32>
    %33 = vector.shape_cast %32 : vector<128xf32> to vector<1x128xf32>
    %cst_21 = arith.constant 1.250000e-01 : f32
    %34 = vector.broadcast %cst_21 : f32 to vector<1x128xf32>
    %35 = arith.mulf %33, %34 : vector<1x128xf32>
    %36 = vector.broadcast %35 : vector<1x128xf32> to vector<8x128xf32>
    %37 = arith.subf %29, %36 : vector<8x128xf32>
    %38 = arith.mulf %37, %37 : vector<8x128xf32>
    %cst_22 = arith.constant dense<0.000000e+00> : vector<128xf32>
    %39 = vector.multi_reduction <add>, %38, %cst_22 [0] : vector<8x128xf32> to vector<128xf32>
    %40 = vector.shape_cast %39 : vector<128xf32> to vector<1x128xf32>
    %cst_23 = arith.constant 1.250000e-01 : f32
    %41 = vector.broadcast %cst_23 : f32 to vector<1x128xf32>
    %42 = arith.mulf %40, %41 : vector<1x128xf32>
    %cst_24 = arith.constant 9.99999974E-6 : f32
    %43 = vector.broadcast %cst_24 : f32 to vector<1x128xf32>
    %44 = arith.addf %42, %43 : vector<1x128xf32>
    %45 = math.rsqrt %44 : vector<1x128xf32>
    %46 = arith.mulf %30, %45 : vector<1x128xf32>
    %47 = vector.broadcast %46 : vector<1x128xf32> to vector<8x128xf32>
    %48 = arith.mulf %37, %47 : vector<8x128xf32>
    %49 = vector.broadcast %31 : vector<1x128xf32> to vector<8x128xf32>
    %50 = arith.addf %48, %49 : vector<8x128xf32>
    %cst_25 = arith.constant 0.000000e+00 : f32
    %51 = vector.broadcast %cst_25 : f32 to vector<8x128xf32>
    %52 = arith.maximumf %50, %51 : vector<8x128xf32>
    %53 = arith.truncf %52 : vector<8x128xf32> to vector<8x128xbf16>
    %c0_26 = arith.constant 0 : index
    %c0_27 = arith.constant 0 : index
    %54 = vector.load %arg7[%c0_26, %c0_27] : memref<128x128xbf16, #tpu.memory_space<vmem>>, vector<128x128xbf16>
    %cst_28 = arith.constant dense<0.000000e+00> : vector<8x128xf32>
    %55 = tpu.matmul %53, %54, %cst_28 {dimension_numbers = #tpu.dot_dimension_numbers<[1], [0], [0], [1], [0, 0, 1, 1], [], []>} : vector<8x128xbf16>, vector<128x128xbf16>, vector<8x128xf32> -> vector<8x128xf32>
    %c0_29 = arith.constant 0 : index
    %c0_30 = arith.constant 0 : index
    %56 = vector.load %arg8[%c0_29, %c0_30] : memref<1x128xf32, #tpu.memory_space<vmem>>, vector<1x128xf32>
    %57 = vector.broadcast %56 : vector<1x128xf32> to vector<8x128xf32>
    %58 = arith.addf %55, %57 : vector<8x128xf32>
    %59 = tpu.iota {dimensions = array<i32: 1>} : vector<8x128xi32>
    %c50_i32 = arith.constant 50 : i32
    %60 = vector.broadcast %c50_i32 : i32 to vector<8x128xi32>
    %61 = arith.cmpi slt, %59, %60 : vector<8x128xi32>
    %cst_31 = arith.constant -1.000000e+30 : f32
    %62 = vector.broadcast %cst_31 : f32 to vector<8x128xf32>
    %63 = arith.select %61, %58, %62 : vector<8x128xi1>, vector<8x128xf32>
    %cst_32 = arith.constant dense<0xFF800000> : vector<8xf32>
    %64 = vector.multi_reduction <maximumf>, %63, %cst_32 [1] : vector<8x128xf32> to vector<8xf32>
    %65 = vector.shape_cast %64 : vector<8xf32> to vector<8x1xf32>
    %66 = vector.broadcast %65 : vector<8x1xf32> to vector<8x128xf32>
    %67 = arith.subf %63, %66 : vector<8x128xf32>
    %68 = math.exp %67 : vector<8x128xf32>
    %cst_33 = arith.constant dense<0.000000e+00> : vector<8xf32>
    %69 = vector.multi_reduction <add>, %68, %cst_33 [1] : vector<8x128xf32> to vector<8xf32>
    %70 = vector.shape_cast %69 : vector<8xf32> to vector<8x1xf32>
    %71 = tpu.reciprocal %70 : vector<8x1xf32> -> vector<8x1xf32>
    %72 = vector.broadcast %71 : vector<8x1xf32> to vector<8x128xf32>
    %73 = arith.mulf %68, %72 : vector<8x128xf32>
    %c0_34 = arith.constant 0 : index
    %c0_35 = arith.constant 0 : index
    %74 = vector.load %arg9[%c0_34, %c0_35] : memref<8x128xf32, #tpu.memory_space<vmem>>, vector<8x128xf32>
    tpu.vector_store %arg9[%c0_34, %c0_35], %73 {strides = array<i32>} : memref<8x128xf32, #tpu.memory_space<vmem>>, vector<8x128xf32>,
    return
  }
}

</mosaic_0001>

<bundles_post_ra>
// kernel: tpu_custom_call.1
= control target key start
LH: loop header
LB: loop body
LE: loop exit
PB: predicated region body
PF: predicated region fallthrough
CT: control target
= control target key end

     0   :  { %14 = vsyncpa [#allocation3], 0  ;;  %s4648_s0 = inlined_call_operand.hbm [shape: f32[8,2870], index: 0, kind: input, shape index: {}]   ;;  %s4649_s1 = inlined_call_operand.hbm [shape: bf16[2870,256], index: 1, kind: input, shape index: {}]   ;;  %s4650_s2 = inlined_call_operand.hbm [shape: f32[1,256], index: 2, kind: input, shape index: {}]   ;;  %s4651_s3 = inlined_call_operand.hbm [shape: f32[1,256], index: 3, kind: input, shape index: {}]   ;;  %s4652_s4 = inlined_call_operand.hbm [shape: bf16[256,128], index: 4, kind: input, shape index: {}]   ;;  %s4653_s5 = inlined_call_operand.hbm [shape: f32[1,128], index: 5, kind: input, shape index: {}]   ;;  %s4654_s6 = inlined_call_operand.hbm [shape: f32[1,128], index: 6, kind: input, shape index: {}]   ;;  %s4655_s7 = inlined_call_operand.hbm [shape: bf16[128,128], index: 7, kind: input, shape index: {}]   ;;  %s4656_s8 = inlined_call_operand.hbm [shape: f32[1,128], index: 8, kind: input, shape index: {}]   ;;  %s4657_s9 = inlined_call_operand.hbm [shape: f32[8,128], index: 9, kind: output, shape index: {}]  }
   0x1   :  { %15 = vsyncpa [#allocation6], 0 }
   0x2   :  { %16 = vsyncpa [#allocation9], 0 }
   0x3   :  { %17 = vsyncpa [#allocation12], 0 }
   0x4   :  { %18 = vsyncpa [#allocation15], 0 }
   0x5   :  { %19 = vsyncpa [#allocation4], 0  ;;  %s4525_s30 = smov [#allocation5]  }
   0x6   :  { %s35_s10 = sshll.u32 %s4525_s30, 4  ;;  %s36_s10 = int_to_ptr.vmem [resolvable:$true] %s35_s10 }
   0x7   :  { %s4321_s11 = scalar_lea.vmem %s36_s10, 45952  ;;  %p4326_p1 = scmp.lt.s32.totalorder %s36_s10, %s36_s10 }
   0x8   :  { %p4322_p0 = scmp.ne.s32.totalorder %s36_s10, %s4321_s11  ;;  %p4327_p2 = scmp.lt.s32.totalorder %s4321_s11, %s4321_s11 }
   0xa   :  { %p4328_p3 = por %p4327_p2, %p4326_p1 }
   0xc   :  { %p4329_p4 = pnand %p4328_p3, %p4322_p0 }
   0xe   :  { %4332 = shalt.err (!%p4329_p4)
}
   0xf   :  { %s4526_s12 = smov 128   ;;  %s4527_s13 = smov 8  }
  0x10   :  { %41 = dma.hbm_to_vmem [thread:$0]  %s4649_s1, 45952, %s36_s10, [#allocation6], %s4526_s12, %s4526_s12, %s4527_s13  }
  0x11   :  { %s4528_s16 = smov [#allocation8]   ;;  %s4529_s18 = smov [#allocation11]  }
  0x12   :  { %s58_s17 = sshll.u32 %s4528_s16, 4  ;;  %s80_s19 = sshll.u32 %s4529_s18, 4  ;;  %s59_s17 = int_to_ptr.vmem [resolvable:$true] %s58_s17  ;;  %s81_s19 = int_to_ptr.vmem [resolvable:$true] %s80_s19 }
  0x13   :  { %s4341_s20 = scalar_lea.vmem %s59_s17, 32  ;;  %p4346_p6 = scmp.lt.s32.totalorder %s59_s17, %s59_s17 }
  0x14   :  { %p4342_p5 = scmp.ne.s32.totalorder %s59_s17, %s4341_s20  ;;  %p4347_p7 = scmp.lt.s32.totalorder %s4341_s20, %s4341_s20 }
  0x16   :  { %p4348_p8 = por %p4347_p7, %p4346_p6 }
  0x18   :  { %p4349_p9 = pnand %p4348_p8, %p4342_p5 }
  0x1a   :  { %4352 = shalt.err (!%p4349_p9)
}
  0x1b   :  { %61 = dma.hbm_to_vmem [thread:$0]  %s4651_s3, 32, %s59_s17, [#allocation9]  }
  0x1c   :  { %s4361_s23 = scalar_lea.vmem %s81_s19, 16  ;;  %s4365_s1 = scalar_lea.vmem %s81_s19, 32 }
  0x1d   :  { %p4362_p10 = scmp.ne.s32.totalorder %s81_s19, %s4361_s23  ;;  %p4366_p11 = scmp.lt.s32.totalorder %s81_s19, %s81_s19 }
  0x1e   :  { %p4367_p12 = scmp.lt.s32.totalorder %s4365_s1, %s4361_s23 }
  0x20   :  { %p4368_p13 = por %p4367_p12, %p4366_p11 }
  0x22   :  { %p4369_p0 = pnand %p4368_p13, %p4362_p10 }
  0x24   :  { %4372 = shalt.err (!%p4369_p0)
}
  0x25   :  { %83 = dma.hbm_to_vmem [thread:$0]  %s4653_s5, 16, %s81_s19, [#allocation12]  }
  0x26   :  { %s4530_s26 = smov [#allocation14]   ;;  %s4531_s28 = smov [#allocation2]  }
  0x27   :  { %s99_s27 = sshll.u32 %s4530_s26, 4  ;;  %s26_s29 = sshll.u32 %s4531_s28, 4  ;;  %s100_s27 = int_to_ptr.vmem [resolvable:$true] %s99_s27  ;;  %s27_s29 = int_to_ptr.vmem [resolvable:$true] %s26_s29 }
  0x28   :  { %s4381_s30 = scalar_lea.vmem %s100_s27, 1024  ;;  %p4386_p2 = scmp.lt.s32.totalorder %s100_s27, %s100_s27 }
  0x29   :  { %p4382_p1 = scmp.ne.s32.totalorder %s100_s27, %s4381_s30  ;;  %p4387_p3 = scmp.lt.s32.totalorder %s4381_s30, %s4381_s30 }
  0x2b   :  { %p4388_p4 = por %p4387_p3, %p4386_p2 }
  0x2d   :  { %p4389_p5 = pnand %p4388_p4, %p4382_p1 }
  0x2f   :  { %4392 = shalt.err (!%p4389_p5)
}
  0x30   :  { %s4532_s3 = smov 64   ;;  %s4533_s10 = smov 4  }
  0x31   :  { %105 = dma.hbm_to_vmem [thread:$0]  %s4655_s7, 1024, %s100_s27, [#allocation15], %s4532_s3, %s4532_s3, %s4533_s10  }
  0x32   :  { %s4401_s5 = scalar_lea.vmem %s27_s29, 2944  ;;  %p4406_p7 = scmp.lt.s32.totalorder %s27_s29, %s27_s29 }
  0x33   :  { %p4402_p6 = scmp.ne.s32.totalorder %s27_s29, %s4401_s5  ;;  %p4407_p8 = scmp.lt.s32.totalorder %s4401_s5, %s4401_s5 }
  0x35   :  { %p4408_p9 = por %p4407_p8, %p4406_p7 }
  0x37   :  { %p4409_p10 = pnand %p4408_p9, %p4402_p6 }
  0x39   :  { %4412 = shalt.err (!%p4409_p10)
}
  0x3a   :  { %29 = dma.hbm_to_vmem [thread:$0]  %s4648_s0, 2944, %s27_s29, [#allocation3]  }
  0x3b   :  { %s4534_s15 = smov [#allocation7]   ;;  %s4535_s17 = smov [#allocation10]  }
  0x3c   :  { %s48_s16 = sshll.u32 %s4534_s15, 4  ;;  %s67_s18 = sshll.u32 %s4535_s17, 4  ;;  %s49_s16 = int_to_ptr.vmem [resolvable:$true] %s48_s16  ;;  %s68_s18 = int_to_ptr.vmem [resolvable:$true] %s67_s18 }
  0x3d   :  { %s4421_s19 = scalar_lea.vmem %s49_s16, 32  ;;  %p4426_p12 = scmp.lt.s32.totalorder %s49_s16, %s49_s16 }
  0x3e   :  { %p4422_p11 = scmp.ne.s32.totalorder %s49_s16, %s4421_s19  ;;  %p4427_p13 = scmp.lt.s32.totalorder %s4421_s19, %s4421_s19 }
  0x40   :  { %p4428_p0 = por %p4427_p13, %p4426_p12 }
  0x42   :  { %p4429_p1 = pnand %p4428_p0, %p4422_p11 }
  0x44   :  { %4432 = shalt.err (!%p4429_p1)
}
  0x45   :  { %51 = dma.hbm_to_vmem [thread:$0]  %s4650_s2, 32, %s49_s16, [#allocation6]  }
  0x46   :  { %s4441_s21 = scalar_lea.vmem %s68_s18, 2048  ;;  %p4446_p3 = scmp.lt.s32.totalorder %s68_s18, %s68_s18 }
  0x47   :  { %p4442_p2 = scmp.ne.s32.totalorder %s68_s18, %s4441_s21  ;;  %p4447_p4 = scmp.lt.s32.totalorder %s4441_s21, %s4441_s21 }
  0x49   :  { %p4448_p5 = por %p4447_p4, %p4446_p3 }
  0x4b   :  { %p4449_p6 = pnand %p4448_p5, %p4442_p2 }
  0x4d   :  { %4452 = shalt.err (!%p4449_p6)
}
  0x4e   :  { %73 = dma.hbm_to_vmem [thread:$0]  %s4652_s4, 2048, %s68_s18, [#allocation9], %s4532_s3, %s4532_s3, %s4533_s10  }
  0x4f   :  { %s4536_s23 = smov [#allocation13]   ;;  %s4537_s24 = smov [#allocation16]  }
  0x50   :  { %s90_s1 = sshll.u32 %s4536_s23, 4  ;;  %s112_s2 = sshll.u32 %s4537_s24, 4  ;;  %s91_s1 = int_to_ptr.vmem [resolvable:$true] %s90_s1  ;;  %s113_s2 = int_to_ptr.vmem [resolvable:$true] %s112_s2 }
  0x51   :  { %s4461_s25 = scalar_lea.vmem %s91_s1, 16  ;;  %s4465_s26 = scalar_lea.vmem %s91_s1, 32 }
  0x52   :  { %p4462_p7 = scmp.ne.s32.totalorder %s91_s1, %s4461_s25  ;;  %p4466_p8 = scmp.lt.s32.totalorder %s91_s1, %s91_s1 }
  0x53   :  { %p4467_p9 = scmp.lt.s32.totalorder %s4465_s26, %s4461_s25 }
  0x55   :  { %p4468_p10 = por %p4467_p9, %p4466_p8 }
  0x57   :  { %p4469_p11 = pnand %p4468_p10, %p4462_p7 }
  0x59   :  { %4472 = shalt.err (!%p4469_p11)
}
  0x5a   :  { %93 = dma.hbm_to_vmem [thread:$0]  %s4654_s6, 16, %s91_s1, [#allocation12]  }
  0x5b   :  { %s4481_s29 = scalar_lea.vmem %s113_s2, 16  ;;  %s4485_s4 = scalar_lea.vmem %s113_s2, 32 }
  0x5c   :  { %p4482_p12 = scmp.ne.s32.totalorder %s113_s2, %s4481_s29  ;;  %p4486_p13 = scmp.lt.s32.totalorder %s113_s2, %s113_s2 }
  0x5d   :  { %p4487_p0 = scmp.lt.s32.totalorder %s4485_s4, %s4481_s29 }
  0x5f   :  { %p4488_p1 = por %p4487_p0, %p4486_p13 }
  0x61   :  { %p4489_p2 = pnand %p4488_p1, %p4482_p12 }
  0x63   :  { %4492 = shalt.err (!%p4489_p2)
}
  0x64   :  { %115 = dma.hbm_to_vmem [thread:$0]  %s4656_s8, 16, %s113_s2, [#allocation15]  }
  0x65   :  { %4513 = dma.done.wait [#allocation3], 2944  }
  0x66   :  { %4514 = vsyncadd [#allocation3], 4294964352 }
  0x67   :  { %4515 = dma.done.wait [#allocation6], 45984  }
  0x68   :  { %4516 = vsyncadd [#allocation6], 4294921312 }
  0x69   :  { %4517 = dma.done.wait [#allocation9], 2080  }
  0x6a   :  { %4518 = vsyncadd [#allocation9], 4294965216 }
  0x6b   :  { %4519 = dma.done.wait [#allocation12], 32  }
  0x6c   :  { %4520 = vsyncadd [#allocation12], 4294967264 }
  0x6d   :  { %4521 = dma.done.wait [#allocation15], 1040  }
  0x6e   :  { %4522 = vsyncadd [#allocation15], 4294966256  ;;  %v3740_v0 = vld [vmem:[#allocation5 + $0x74] ss:$8 sps:$4 sm:$0xff]   ;;  %v3744_v2 = vld [vmem:[#allocation5 + $0x70] ss:$8 sps:$4 sm:$0xff]  }
  0x6f   :  { %v3742_v1 = vld [vmem:[#allocation5 + $0x174] ss:$8 sps:$4 sm:$0xff]   ;;  %2355 = vmatprep.subr.bf16.mxu0 %v3740_v0  ;;  %v3745_v3 = vld [vmem:[#allocation5 + $0x170] ss:$8 sps:$4 sm:$0xff]   ;;  %v3746_v4 = vld [vmem:[#allocation5 + $0x64] ss:$8 sps:$4 sm:$0xff]  }
  0x70   :  { %2396 = vmatprep.subr.bf16.mxu1 %v3742_v1  ;;  %2356 = vmatpush1.bf16.msra.mxu0 %v3744_v2  ;;  %v3748_v5 = vld [vmem:[#allocation5 + $0x164] ss:$8 sps:$4 sm:$0xff]   ;;  %v3750_v6 = vld [vmem:[#allocation5 + $0x60] ss:$8 sps:$4 sm:$0xff]   ;;  %v3752_v8 = vld [vmem:[#allocation5 + $0x54] ss:$8 sps:$4 sm:$0xff]  }
  0x71   :  { %2397 = vmatpush1.bf16.msra.mxu1 %v3745_v3  ;;  %2357 = vmatprep.subr.bf16.mxu0 %v3746_v4  ;;  %v3751_v7 = vld [vmem:[#allocation5 + $0x160] ss:$8 sps:$4 sm:$0xff]   ;;  %v3754_v9 = vld [vmem:[#allocation5 + $0x154] ss:$8 sps:$4 sm:$0xff]   ;;  %v3756_v10 = vld [vmem:[#allocation5 + $0x50] ss:$8 sps:$4 sm:$0xff]  }
  0x72   :  { %2398 = vmatprep.subr.bf16.mxu1 %v3748_v5  ;;  %v3757_v11 = vld [vmem:[#allocation5 + $0x150] ss:$8 sps:$4 sm:$0xff]   ;;  %v3758_v12 = vld [vmem:[#allocation5 + $0x44] ss:$8 sps:$4 sm:$0xff]   ;;  %v3762_v14 = vld [vmem:[#allocation5 + $0x40] ss:$8 sps:$4 sm:$0xff]  }
  0x73   :  { %v3760_v13 = vld [vmem:[#allocation5 + $0x144] ss:$8 sps:$4 sm:$0xff]   ;;  %v3763_v15 = vld [vmem:[#allocation5 + $0x140] ss:$8 sps:$4 sm:$0xff]   ;;  %v3764_v16 = vld [vmem:[#allocation5 + $0x34] ss:$8 sps:$4 sm:$0xff]  }
  0x74   :  { %2358 = vmatpush1.bf16.msra.mxu0 %v3750_v6  ;;  %v3766_v17 = vld [vmem:[#allocation5 + $0x134] ss:$8 sps:$4 sm:$0xff]   ;;  %v3768_v18 = vld [vmem:[#allocation5 + $0x30] ss:$8 sps:$4 sm:$0xff]   ;;  %v3770_v20 = vld [vmem:[#allocation5 + $0x24] ss:$8 sps:$4 sm:$0xff]  }
  0x75   :  { %2399 = vmatpush1.bf16.msra.mxu1 %v3751_v7  ;;  %2359 = vmatprep.subr.bf16.mxu0 %v3752_v8  ;;  %v3769_v19 = vld [vmem:[#allocation5 + $0x130] ss:$8 sps:$4 sm:$0xff]   ;;  %v3772_v21 = vld [vmem:[#allocation5 + $0x124] ss:$8 sps:$4 sm:$0xff]   ;;  %v3774_v22 = vld [vmem:[#allocation5 + $0x20] ss:$8 sps:$4 sm:$0xff]  }
  0x76   :  { %2400 = vmatprep.subr.bf16.mxu1 %v3754_v9  ;;  %v3775_v23 = vld [vmem:[#allocation5 + $0x120] ss:$8 sps:$4 sm:$0xff]   ;;  %v3776_v24 = vld [vmem:[#allocation5 + $0x14] ss:$8 sps:$4 sm:$0xff]   ;;  %v3780_v26 = vld [vmem:[#allocation5 + $0x10] ss:$8 sps:$4 sm:$0xff]  }
  0x77   :  { %v3778_v25 = vld [vmem:[#allocation5 + $0x114] ss:$8 sps:$4 sm:$0xff]   ;;  %v3781_v27 = vld [vmem:[#allocation5 + $0x110] ss:$8 sps:$4 sm:$0xff]   ;;  %v3782_v28 = vld [vmem:[#allocation5 + $0x4] ss:$8 sps:$4 sm:$0xff]  }
  0x78   :  { %2360 = vmatpush1.bf16.msra.mxu0 %v3756_v10  ;;  %v3784_v29 = vld [vmem:[#allocation5 + $0x104] ss:$8 sps:$4 sm:$0xff]   ;;  %v3786_v30 = vld [vmem:[#allocation5] ss:$8 sps:$4 sm:$0xff]   ;;  %v3788_v32 = vld [vmem:[#allocation5 + $0xf4] ss:$8 sps:$4 sm:$0xff]  }
  0x79   :  { %2401 = vmatpush1.bf16.msra.mxu1 %v3757_v11  ;;  %2361 = vmatprep.subr.bf16.mxu0 %v3758_v12  ;;  %v3787_v31 = vld [vmem:[#allocation5 + $0x100] ss:$8 sps:$4 sm:$0xff]   ;;  %v3790_v33 = vld [vmem:[#allocation5 + $0x1f4] ss:$8 sps:$4 sm:$0xff]   ;;  %v3792_v34 = vld [vmem:[#allocation5 + $0xf0] ss:$8 sps:$4 sm:$0xff]  }
  0x7a   :  { %2402 = vmatprep.subr.bf16.mxu1 %v3760_v13  ;;  %v3793_v35 = vld [vmem:[#allocation5 + $0x1f0] ss:$8 sps:$4 sm:$0xff]   ;;  %v3794_v36 = vld [vmem:[#allocation5 + $0xe4] ss:$8 sps:$4 sm:$0xff]   ;;  %v3798_v38 = vld [vmem:[#allocation5 + $0xe0] ss:$8 sps:$4 sm:$0xff]  }
  0x7b   :  { %v3796_v37 = vld [vmem:[#allocation5 + $0x1e4] ss:$8 sps:$4 sm:$0xff]   ;;  %v3799_v39 = vld [vmem:[#allocation5 + $0x1e0] ss:$8 sps:$4 sm:$0xff]   ;;  %v3800_v40 = vld [vmem:[#allocation5 + $0xd4] ss:$8 sps:$4 sm:$0xff]  }
  0x7c   :  { %2362 = vmatpush1.bf16.msra.mxu0 %v3762_v14  ;;  %v3802_v41 = vld [vmem:[#allocation5 + $0x1d4] ss:$8 sps:$4 sm:$0xff]   ;;  %v3804_v42 = vld [vmem:[#allocation5 + $0xd0] ss:$8 sps:$4 sm:$0xff]   ;;  %v3806_v44 = vld [vmem:[#allocation5 + $0xc4] ss:$8 sps:$4 sm:$0xff]  }
  0x7d   :  { %2403 = vmatpush1.bf16.msra.mxu1 %v3763_v15  ;;  %2363 = vmatprep.subr.bf16.mxu0 %v3764_v16  ;;  %v3805_v43 = vld [vmem:[#allocation5 + $0x1d0] ss:$8 sps:$4 sm:$0xff]   ;;  %v3808_v45 = vld [vmem:[#allocation5 + $0x1c4] ss:$8 sps:$4 sm:$0xff]   ;;  %v3810_v47 = vld [vmem:[#allocation5 + $0xc0] ss:$8 sps:$4 sm:$0xff]  }
  0x7e   :  { %2404 = vmatprep.subr.bf16.mxu1 %v3766_v17  ;;  %v145_v46 = vld [vmem:[#allocation2 + $0x8] sm:$0xff]  ;;  %v3811_v48 = vld [vmem:[#allocation5 + $0x1c0] ss:$8 sps:$4 sm:$0xff]   ;;  %v3818_v56 = vld [vmem:[#allocation5 + $0xa4] ss:$8 sps:$4 sm:$0xff]   ;;  %vm2348_vm0 = vcmask 1042432  }
  0x7f   :  { %v168_v49 = vpack.c.bf16 %v145_v46, %v145_v46  ;;  %v147_v50 = vld [vmem:[#allocation2 + $0x18] sm:$0xff]  ;;  %v3812_v51 = vld [vmem:[#allocation5 + $0xb4] ss:$8 sps:$4 sm:$0xff]   ;;  %v3816_v54 = vld [vmem:[#allocation5 + $0xb0] ss:$8 sps:$4 sm:$0xff]   ;;  %vm2344_vm1 = vcmask 441344  }
  0x80   :  { %2364 = vmatpush1.bf16.msra.mxu0 %v3768_v18  ;;  %v170_v52 = vpack.c.bf16 %v147_v50, %v147_v50  ;;  %v3814_v53 = vld [vmem:[#allocation5 + $0x1b4] ss:$8 sps:$4 sm:$0xff]   ;;  %v3817_v55 = vld [vmem:[#allocation5 + $0x1b0] ss:$8 sps:$4 sm:$0xff]   ;;  %v3820_v57 = vld [vmem:[#allocation5 + $0x1a4] ss:$8 sps:$4 sm:$0xff]  }
  0x81   :  { %2405 = vmatpush1.bf16.msra.mxu1 %v3769_v19  ;;  %2365 = vmatprep.subr.bf16.mxu0 %v3770_v20  ;;  %v3822_v58 = vld [vmem:[#allocation5 + $0xa0] ss:$8 sps:$4 sm:$0xff]   ;;  %v3824_v60 = vld [vmem:[#allocation5 + $0x94] ss:$8 sps:$4 sm:$0xff]   ;;  %v3828_v62 = vld [vmem:[#allocation5 + $0x90] ss:$8 sps:$4 sm:$0xff]  }
  0x82   :  { %2406 = vmatprep.subr.bf16.mxu1 %v3772_v21  ;;  %2387 = vmatprep.mubr.bf16.mxu0 %v168_v49  ;;  %v3823_v59 = vld [vmem:[#allocation5 + $0x1a0] ss:$8 sps:$4 sm:$0xff]   ;;  %v3826_v61 = vld [vmem:[#allocation5 + $0x194] ss:$8 sps:$4 sm:$0xff]   ;;  %v3829_v63 = vld [vmem:[#allocation5 + $0x190] ss:$8 sps:$4 sm:$0xff]  }
  0x83   :  { %2428 = vmatprep.mubr.bf16.mxu1 %v170_v52  ;;  %v3830_v0 = vld [vmem:[#allocation5 + $0x84] ss:$8 sps:$4 sm:$0xff]   ;;  %v3834_v2 = vld [vmem:[#allocation5 + $0x80] ss:$8 sps:$4 sm:$0xff]   ;;  %v146_v5 = vld [vmem:[#allocation2 + $0x10] sm:$0xff]  ;;  %vm4541_vm2 = vmmov 0  }
  0x84   :  { %2366 = vmatpush1.bf16.msra.mxu0 %v3774_v22  ;;  %v3832_v1 = vld [vmem:[#allocation5 + $0x184] ss:$8 sps:$4 sm:$0xff]   ;;  %v3835_v3 = vld [vmem:[#allocation5 + $0x180] ss:$8 sps:$4 sm:$0xff]   ;;  %v3838_v6 = vld [vmem:[#allocation5 + $0x274] ss:$8 sps:$4 sm:$0xff]   ;;  %v169_v9 = vpack.c.bf16 %v146_v5, %v146_v5 }
  0x85   :  { %2407 = vmatpush1.bf16.msra.mxu1 %v3775_v23  ;;  %2367 = vmatprep.subr.bf16.mxu0 %v3776_v24  ;;  %v144_v4 = vld [vmem:[#allocation2] sm:$0xff]  ;;  %v3841_v7 = vld [vmem:[#allocation5 + $0x374] ss:$8 sps:$4 sm:$0xff]   ;;  %v3836_v10 = vld [vmem:[#allocation5 + $0x270] ss:$8 sps:$4 sm:$0xff]   ;;  %s4542_s6 = smov [#allocation17]  }
  0x86   :  { %2408 = vmatprep.subr.bf16.mxu1 %v3778_v25  ;;  %v167_v8 = vpack.c.bf16 %v144_v4, %v144_v4  ;;  %v3839_v11 = vld [vmem:[#allocation5 + $0x370] ss:$8 sps:$4 sm:$0xff]   ;;  %v3844_v12 = vld [vmem:[#allocation5 + $0x264] ss:$8 sps:$4 sm:$0xff]   ;;  %v3842_v14 = vld [vmem:[#allocation5 + $0x260] ss:$8 sps:$4 sm:$0xff]  }
  0x87   :  { %v3847_v13 = vld [vmem:[#allocation5 + $0x364] ss:$8 sps:$4 sm:$0xff]   ;;  %v3845_v15 = vld [vmem:[#allocation5 + $0x360] ss:$8 sps:$4 sm:$0xff]   ;;  %v3850_v16 = vld [vmem:[#allocation5 + $0x254] ss:$8 sps:$4 sm:$0xff]  }
  0x88   :  { %2368 = vmatpush1.bf16.msra.mxu0 %v3780_v26  ;;  %v3853_v17 = vld [vmem:[#allocation5 + $0x354] ss:$8 sps:$4 sm:$0xff]   ;;  %v3848_v18 = vld [vmem:[#allocation5 + $0x250] ss:$8 sps:$4 sm:$0xff]   ;;  %v3856_v20 = vld [vmem:[#allocation5 + $0x244] ss:$8 sps:$4 sm:$0xff]  }
  0x89   :  { %2409 = vmatpush1.bf16.msra.mxu1 %v3781_v27  ;;  %2369 = vmatprep.subr.bf16.mxu0 %v3782_v28  ;;  %v3851_v19 = vld [vmem:[#allocation5 + $0x350] ss:$8 sps:$4 sm:$0xff]   ;;  %v3859_v21 = vld [vmem:[#allocation5 + $0x344] ss:$8 sps:$4 sm:$0xff]   ;;  %v3854_v22 = vld [vmem:[#allocation5 + $0x240] ss:$8 sps:$4 sm:$0xff]  }
  0x8a   :  { %2410 = vmatprep.subr.bf16.mxu1 %v3784_v29  ;;  %v3857_v23 = vld [vmem:[#allocation5 + $0x340] ss:$8 sps:$4 sm:$0xff]   ;;  %v3862_v24 = vld [vmem:[#allocation5 + $0x234] ss:$8 sps:$4 sm:$0xff]   ;;  %v3860_v26 = vld [vmem:[#allocation5 + $0x230] ss:$8 sps:$4 sm:$0xff]  }
  0x8b   :  { %v3865_v25 = vld [vmem:[#allocation5 + $0x334] ss:$8 sps:$4 sm:$0xff]   ;;  %v3863_v27 = vld [vmem:[#allocation5 + $0x330] ss:$8 sps:$4 sm:$0xff]   ;;  %v3868_v28 = vld [vmem:[#allocation5 + $0x224] ss:$8 sps:$4 sm:$0xff]  }
  0x8c   :  { %2370 = vmatpush1.bf16.msra.mxu0 %v3786_v30  ;;  %v3871_v29 = vld [vmem:[#allocation5 + $0x324] ss:$8 sps:$4 sm:$0xff]   ;;  %v3866_v30 = vld [vmem:[#allocation5 + $0x220] ss:$8 sps:$4 sm:$0xff]   ;;  %v3884_v46 = vld [vmem:[#allocation5 + $0x2f0] ss:$8 sps:$4 sm:$0xff]  }
  0x8d   :  { %2411 = vmatpush1.bf16.msra.mxu1 %v3787_v31  ;;  %2371 = vmatprep.subr.bf16.mxu0 %v3788_v32  ;;  %v3869_v31 = vld [vmem:[#allocation5 + $0x320] ss:$8 sps:$4 sm:$0xff]   ;;  %v3874_v32 = vld [vmem:[#allocation5 + $0x214] ss:$8 sps:$4 sm:$0xff]   ;;  %v3895_v49 = vld [vmem:[#allocation5 + $0x3e4] ss:$8 sps:$4 sm:$0xff]  }
  0x8e   :  { %2412 = vmatprep.subr.bf16.mxu1 %v3790_v33  ;;  %v3877_v33 = vld [vmem:[#allocation5 + $0x314] ss:$8 sps:$4 sm:$0xff]   ;;  %v3890_v50 = vld [vmem:[#allocation5 + $0x2e0] ss:$8 sps:$4 sm:$0xff]   ;;  %s3270_s8 = sshll.u32 %s4542_s6, 4  ;;  %s3271_s8 = int_to_ptr.vmem [resolvable:$true] %s3270_s8 }
  0x8f   :  { %v3898_v52 = vld [vmem:[#allocation5 + $0x2d4] ss:$8 sps:$4 sm:$0xff]   ;;  %s4493_s10 = scalar_lea.vmem %s3271_s8, 128  ;;  %p4498_p4 = scmp.lt.s32.totalorder %s3271_s8, %s3271_s8 }
  0x90   :  { %2372 = vmatpush2.bf16.msra.mxu0 %v3792_v34  ;;  %v149_v34 = vld [vmem:[#allocation2 + $0x28] sm:$0xff]  ;;  %p4494_p3 = scmp.ne.s32.totalorder %s3271_s8, %s4493_s10  ;;  %p4499_p5 = scmp.lt.s32.totalorder %s4493_s10, %s4493_s10 }
  0x91   :  { %2413 = vmatpush2.bf16.msra.mxu1 %v3793_v35  ;;  %2373 = vmatprep.subr.bf16.mxu0 %v3794_v36  ;;  %v3872_v35 = vld [vmem:[#allocation5 + $0x210] ss:$8 sps:$4 sm:$0xff]   ;;  %v172_v36 = vpack.c.bf16 %v149_v34, %v149_v34  ;;  %v3922_v4 = vld [vmem:[#allocation5 + $0x294] ss:$8 sps:$4 sm:$0xff]   ;;  %v3950_v34 = vld [vmem:[#allocation5 + $0x440] ss:$8 sps:$4 sm:$0xff]  }
  0x92   :  { %2414 = vmatprep.subr.bf16.mxu1 %v3796_v37  ;;  %v3875_v37 = vld [vmem:[#allocation5 + $0x310] ss:$8 sps:$4 sm:$0xff]   ;;  %v3925_v5 = vld [vmem:[#allocation5 + $0x394] ss:$8 sps:$4 sm:$0xff]   ;;  %p4500_p6 = por %p4499_p5, %p4498_p4 }
  0x94   :  { %2374 = vmatpush2.bf16.msra.mxu0 %v3798_v38  ;;  %v3880_v38 = vld [vmem:[#allocation5 + $0x204] ss:$8 sps:$4 sm:$0xff]   ;;  %p4501_p7 = pnand %p4500_p6, %p4494_p3 }
  0x95   :  { %2415 = vmatpush2.bf16.msra.mxu1 %v3799_v39  ;;  %2375 = vmatprep.subr.bf16.mxu0 %v3800_v40  ;;  %v151_v39 = vld [vmem:[#allocation2 + $0x38] sm:$0xff] }
  0x96   :  { %2416 = vmatprep.subr.bf16.mxu1 %v3802_v41  ;;  %v3883_v40 = vld [vmem:[#allocation5 + $0x304] ss:$8 sps:$4 sm:$0xff]   ;;  %v174_v41 = vpack.c.bf16 %v151_v39, %v151_v39  ;;  %v3959_v39 = vld [vmem:[#allocation5 + $0x530] ss:$8 sps:$4 sm:$0xff]  }
  0x98   :  { %2376 = vmatpush2.bf16.msra.mxu0 %v3804_v42  ;;  %v3878_v42 = vld [vmem:[#allocation5 + $0x200] ss:$8 sps:$4 sm:$0xff]  }
  0x99   :  { %2417 = vmatpush2.bf16.msra.mxu1 %v3805_v43  ;;  %2377 = vmatprep.subr.bf16.mxu0 %v3806_v44  ;;  %v3881_v43 = vld [vmem:[#allocation5 + $0x300] ss:$8 sps:$4 sm:$0xff]   ;;  %v3886_v44 = vld [vmem:[#allocation5 + $0x2f4] ss:$8 sps:$4 sm:$0xff]  }
  0x9a   :  { %2418 = vmatprep.subr.bf16.mxu1 %v3808_v45  ;;  %v3889_v45 = vld [vmem:[#allocation5 + $0x3f4] ss:$8 sps:$4 sm:$0xff]  }
  0x9c   :  { %2378 = vmatpush2.bf16.msra.mxu0 %v3810_v47  ;;  %v3887_v47 = vld [vmem:[#allocation5 + $0x3f0] ss:$8 sps:$4 sm:$0xff]  }
  0x9d   :  { %2419 = vmatpush2.bf16.msra.mxu1 %v3811_v48  ;;  %2379 = vmatprep.subr.bf16.mxu0 %v3812_v51  ;;  %v3892_v48 = vld [vmem:[#allocation5 + $0x2e4] ss:$8 sps:$4 sm:$0xff]   ;;  %v3893_v51 = vld [vmem:[#allocation5 + $0x3e0] ss:$8 sps:$4 sm:$0xff]  }
  0x9e   :  { %2420 = vmatprep.subr.bf16.mxu1 %v3814_v53  ;;  %v3901_v53 = vld [vmem:[#allocation5 + $0x3d4] ss:$8 sps:$4 sm:$0xff]  }
  0xa0   :  { %2380 = vmatpush2.bf16.msra.mxu0 %v3816_v54  ;;  %v3896_v54 = vld [vmem:[#allocation5 + $0x2d0] ss:$8 sps:$4 sm:$0xff]  }
  0xa1   :  { %2421 = vmatpush2.bf16.msra.mxu1 %v3817_v55  ;;  %2381 = vmatprep.subr.bf16.mxu0 %v3818_v56  ;;  %v3899_v55 = vld [vmem:[#allocation5 + $0x3d0] ss:$8 sps:$4 sm:$0xff]   ;;  %v3904_v56 = vld [vmem:[#allocation5 + $0x2c4] ss:$8 sps:$4 sm:$0xff]  }
  0xa2   :  { %2422 = vmatprep.subr.bf16.mxu1 %v3820_v57  ;;  %v3907_v57 = vld [vmem:[#allocation5 + $0x3c4] ss:$8 sps:$4 sm:$0xff]  }
  0xa4   :  { %2382 = vmatpush2.bf16.msra.mxu0 %v3822_v58  ;;  %v3902_v58 = vld [vmem:[#allocation5 + $0x2c0] ss:$8 sps:$4 sm:$0xff]  }
  0xa5   :  { %2423 = vmatpush2.bf16.msra.mxu1 %v3823_v59  ;;  %2383 = vmatprep.subr.bf16.mxu0 %v3824_v60  ;;  %v3905_v59 = vld [vmem:[#allocation5 + $0x3c0] ss:$8 sps:$4 sm:$0xff]   ;;  %v3910_v60 = vld [vmem:[#allocation5 + $0x2b4] ss:$8 sps:$4 sm:$0xff]  }
  0xa6   :  { %2424 = vmatprep.subr.bf16.mxu1 %v3826_v61  ;;  %v3913_v61 = vld [vmem:[#allocation5 + $0x3b4] ss:$8 sps:$4 sm:$0xff]  }
  0xa8   :  { %2384 = vmatpush2.bf16.msra.mxu0 %v3828_v62  ;;  %v3908_v62 = vld [vmem:[#allocation5 + $0x2b0] ss:$8 sps:$4 sm:$0xff]  }
  0xa9   :  { %2425 = vmatpush2.bf16.msra.mxu1 %v3829_v63  ;;  %2385 = vmatprep.subr.bf16.mxu0 %v3830_v0  ;;  %v3911_v63 = vld [vmem:[#allocation5 + $0x3b0] ss:$8 sps:$4 sm:$0xff]   ;;  %v3916_v0 = vld [vmem:[#allocation5 + $0x2a4] ss:$8 sps:$4 sm:$0xff]  }
  0xaa   :  { %2426 = vmatprep.subr.bf16.mxu1 %v3832_v1  ;;  %v3919_v1 = vld [vmem:[#allocation5 + $0x3a4] ss:$8 sps:$4 sm:$0xff]  }
  0xac   :  { %2386 = vmatpush2.bf16.msra.mxu0 %v3834_v2  ;;  %v3914_v2 = vld [vmem:[#allocation5 + $0x2a0] ss:$8 sps:$4 sm:$0xff]  }
  0xad   :  { %2427 = vmatpush2.bf16.msra.mxu1 %v3835_v3  ;;  %2437 = vmatprep.subr.bf16.mxu0 %v3838_v6  ;;  %v3917_v3 = vld [vmem:[#allocation5 + $0x3a0] ss:$8 sps:$4 sm:$0xff]   ;;  %v3920_v6 = vld [vmem:[#allocation5 + $0x290] ss:$8 sps:$4 sm:$0xff]  }
  0xae   :  { %2478 = vmatprep.subr.bf16.mxu1 %v3841_v7  ;;  %v3923_v7 = vld [vmem:[#allocation5 + $0x390] ss:$8 sps:$4 sm:$0xff]  }
  0xaf   :  { %2388 = vmatmul.mubr.bf16.vlgmr.msra.gmra.mxu0 %v167_v8  ;;  %v3928_v8 = vld [vmem:[#allocation5 + $0x284] ss:$8 sps:$4 sm:$0xff]  }
  0xb0   :  { %2429 = vmatmul.mubr.bf16.vlgmr.msra.gmra.mxu1 %v169_v9  ;;  %2438 = vmatpush1.bf16.msra.mxu0 %v3836_v10  ;;  %v3931_v9 = vld [vmem:[#allocation5 + $0x384] ss:$8 sps:$4 sm:$0xff]   ;;  %v3926_v10 = vld [vmem:[#allocation5 + $0x280] ss:$8 sps:$4 sm:$0xff]  }
  0xb1   :  { %2479 = vmatpush1.bf16.msra.mxu1 %v3839_v11  ;;  %2439 = vmatprep.subr.bf16.mxu0 %v3844_v12  ;;  %v3929_v11 = vld [vmem:[#allocation5 + $0x380] ss:$8 sps:$4 sm:$0xff]  }
  0xb2   :  { %2480 = vmatprep.subr.bf16.mxu1 %v3847_v13  ;;  %2469 = vmatprep.mubr.bf16.mxu0 %v172_v36  ;;  %v148_v12 = vld [vmem:[#allocation2 + $0x20] sm:$0xff]  ;;  %v3934_v13 = vld [vmem:[#allocation5 + $0x474] ss:$8 sps:$4 sm:$0xff]  }
  0xb3   :  { %2510 = vmatprep.mubr.bf16.mxu1 %v174_v41  ;;  %v3958_v36 = vld [vmem:[#allocation5 + $0x434] ss:$8 sps:$4 sm:$0xff]   ;;  %v3967_v41 = vld [vmem:[#allocation5 + $0x524] ss:$8 sps:$4 sm:$0xff]  }
  0xb4   :  { %2440 = vmatpush1.bf16.msra.mxu0 %v3842_v14  ;;  %v150_v14 = vld [vmem:[#allocation2 + $0x30] sm:$0xff] }
  0xb5   :  { %2481 = vmatpush1.bf16.msra.mxu1 %v3845_v15  ;;  %2441 = vmatprep.subr.bf16.mxu0 %v3850_v16  ;;  %v3937_v15 = vld [vmem:[#allocation5 + $0x574] ss:$8 sps:$4 sm:$0xff]   ;;  %v171_v16 = vpack.c.bf16 %v148_v12, %v148_v12 }
  0xb6   :  { %2482 = vmatprep.subr.bf16.mxu1 %v3853_v17  ;;  %v3932_v17 = vld [vmem:[#allocation5 + $0x470] ss:$8 sps:$4 sm:$0xff]   ;;  %v4018_v12 = vld [vmem:[#allocation5 + $0x494] ss:$8 sps:$4 sm:$0xff]  }
  0xb8   :  { %2442 = vmatpush1.bf16.msra.mxu0 %v3848_v18  ;;  %v173_v18 = vpack.c.bf16 %v150_v14, %v150_v14  ;;  %v4016_v14 = vld [vmem:[#allocation5 + $0x490] ss:$8 sps:$4 sm:$0xff]  }
  0xb9   :  { %2483 = vmatpush1.bf16.msra.mxu1 %v3851_v19  ;;  %2443 = vmatprep.subr.bf16.mxu0 %v3856_v20  ;;  %v3935_v19 = vld [vmem:[#allocation5 + $0x570] ss:$8 sps:$4 sm:$0xff]   ;;  %v3940_v20 = vld [vmem:[#allocation5 + $0x464] ss:$8 sps:$4 sm:$0xff]  }
  0xba   :  { %2484 = vmatprep.subr.bf16.mxu1 %v3859_v21  ;;  %v3943_v21 = vld [vmem:[#allocation5 + $0x564] ss:$8 sps:$4 sm:$0xff]  }
  0xbc   :  { %2444 = vmatpush1.bf16.msra.mxu0 %v3854_v22  ;;  %v153_v22 = vld [vmem:[#allocation2 + $0x48] sm:$0xff] }
  0xbd   :  { %2485 = vmatpush1.bf16.msra.mxu1 %v3857_v23  ;;  %2445 = vmatprep.subr.bf16.mxu0 %v3862_v24  ;;  %v3938_v23 = vld [vmem:[#allocation5 + $0x460] ss:$8 sps:$4 sm:$0xff]   ;;  %v176_v24 = vpack.c.bf16 %v153_v22, %v153_v22  ;;  %v154_v22 = vld [vmem:[#allocation2 + $0x50] sm:$0xff] }
  0xbe   :  { %2486 = vmatprep.subr.bf16.mxu1 %v3865_v25  ;;  %v3941_v25 = vld [vmem:[#allocation5 + $0x560] ss:$8 sps:$4 sm:$0xff]  }
  0xc0   :  { %2446 = vmatpush1.bf16.msra.mxu0 %v3860_v26  ;;  %v3946_v26 = vld [vmem:[#allocation5 + $0x454] ss:$8 sps:$4 sm:$0xff]  }
  0xc1   :  { %2487 = vmatpush1.bf16.msra.mxu1 %v3863_v27  ;;  %2447 = vmatprep.subr.bf16.mxu0 %v3868_v28  ;;  %v155_v27 = vld [vmem:[#allocation2 + $0x58] sm:$0xff]  ;;  %v3949_v28 = vld [vmem:[#allocation5 + $0x554] ss:$8 sps:$4 sm:$0xff]  }
  0xc2   :  { %2488 = vmatprep.subr.bf16.mxu1 %v3871_v29  ;;  %v178_v29 = vpack.c.bf16 %v155_v27, %v155_v27  ;;  %v177_v27 = vpack.c.bf16 %v154_v22, %v154_v22  ;;  %v4112_v22 = vld [vmem:[#allocation5 + $0x690] ss:$8 sps:$4 sm:$0xff]  }
  0xc4   :  { %2448 = vmatpush1.bf16.msra.mxu0 %v3866_v30  ;;  %v3944_v30 = vld [vmem:[#allocation5 + $0x450] ss:$8 sps:$4 sm:$0xff]  }
  0xc5   :  { %2489 = vmatpush1.bf16.msra.mxu1 %v3869_v31  ;;  %2449 = vmatprep.subr.bf16.mxu0 %v3874_v32  ;;  %v3947_v31 = vld [vmem:[#allocation5 + $0x550] ss:$8 sps:$4 sm:$0xff]   ;;  %v3952_v32 = vld [vmem:[#allocation5 + $0x444] ss:$8 sps:$4 sm:$0xff]  }
  0xc6   :  { %2490 = vmatprep.subr.bf16.mxu1 %v3877_v33  ;;  %v3955_v33 = vld [vmem:[#allocation5 + $0x544] ss:$8 sps:$4 sm:$0xff]  }
  0xc8   :  { %2450 = vmatpush1.bf16.msra.mxu0 %v3872_v35  ;;  %v3953_v35 = vld [vmem:[#allocation5 + $0x540] ss:$8 sps:$4 sm:$0xff]  }
  0xc9   :  { %2491 = vmatpush1.bf16.msra.mxu1 %v3875_v37  ;;  %2451 = vmatprep.subr.bf16.mxu0 %v3880_v38  ;;  %v3961_v37 = vld [vmem:[#allocation5 + $0x534] ss:$8 sps:$4 sm:$0xff]   ;;  %v3956_v38 = vld [vmem:[#allocation5 + $0x430] ss:$8 sps:$4 sm:$0xff]  }
  0xca   :  { %2492 = vmatprep.subr.bf16.mxu1 %v3883_v40  ;;  %v3964_v40 = vld [vmem:[#allocation5 + $0x424] ss:$8 sps:$4 sm:$0xff]  }
  0xcc   :  { %2452 = vmatpush1.bf16.msra.mxu0 %v3878_v42  ;;  %v3962_v42 = vld [vmem:[#allocation5 + $0x420] ss:$8 sps:$4 sm:$0xff]  }
  0xcd   :  { %2493 = vmatpush1.bf16.msra.mxu1 %v3881_v43  ;;  %2453 = vmatprep.subr.bf16.mxu0 %v3886_v44  ;;  %v3965_v43 = vld [vmem:[#allocation5 + $0x520] ss:$8 sps:$4 sm:$0xff]   ;;  %v3970_v44 = vld [vmem:[#allocation5 + $0x414] ss:$8 sps:$4 sm:$0xff]  }
  0xce   :  { %2494 = vmatprep.subr.bf16.mxu1 %v3889_v45  ;;  %v3973_v45 = vld [vmem:[#allocation5 + $0x514] ss:$8 sps:$4 sm:$0xff]  }
  0xd0   :  { %2454 = vmatpush2.bf16.msra.mxu0 %v3884_v46  ;;  %v3968_v46 = vld [vmem:[#allocation5 + $0x410] ss:$8 sps:$4 sm:$0xff]  }
  0xd1   :  { %2495 = vmatpush2.bf16.msra.mxu1 %v3887_v47  ;;  %2455 = vmatprep.subr.bf16.mxu0 %v3892_v48  ;;  %v3971_v47 = vld [vmem:[#allocation5 + $0x510] ss:$8 sps:$4 sm:$0xff]   ;;  %v3976_v48 = vld [vmem:[#allocation5 + $0x404] ss:$8 sps:$4 sm:$0xff]  }
  0xd2   :  { %2496 = vmatprep.subr.bf16.mxu1 %v3895_v49  ;;  %v3979_v49 = vld [vmem:[#allocation5 + $0x504] ss:$8 sps:$4 sm:$0xff]  }
  0xd4   :  { %2456 = vmatpush2.bf16.msra.mxu0 %v3890_v50  ;;  %v3974_v50 = vld [vmem:[#allocation5 + $0x400] ss:$8 sps:$4 sm:$0xff]  }
  0xd5   :  { %2497 = vmatpush2.bf16.msra.mxu1 %v3893_v51  ;;  %2457 = vmatprep.subr.bf16.mxu0 %v3898_v52  ;;  %v3977_v51 = vld [vmem:[#allocation5 + $0x500] ss:$8 sps:$4 sm:$0xff]   ;;  %v3982_v52 = vld [vmem:[#allocation5 + $0x4f4] ss:$8 sps:$4 sm:$0xff]  }
  0xd6   :  { %2498 = vmatprep.subr.bf16.mxu1 %v3901_v53  ;;  %v3985_v53 = vld [vmem:[#allocation5 + $0x5f4] ss:$8 sps:$4 sm:$0xff]  }
  0xd8   :  { %2458 = vmatpush2.bf16.msra.mxu0 %v3896_v54  ;;  %v3980_v54 = vld [vmem:[#allocation5 + $0x4f0] ss:$8 sps:$4 sm:$0xff]  }
  0xd9   :  { %2499 = vmatpush2.bf16.msra.mxu1 %v3899_v55  ;;  %2459 = vmatprep.subr.bf16.mxu0 %v3904_v56  ;;  %v3983_v55 = vld [vmem:[#allocation5 + $0x5f0] ss:$8 sps:$4 sm:$0xff]   ;;  %v3988_v56 = vld [vmem:[#allocation5 + $0x4e4] ss:$8 sps:$4 sm:$0xff]  }
  0xda   :  { %2500 = vmatprep.subr.bf16.mxu1 %v3907_v57  ;;  %v3991_v57 = vld [vmem:[#allocation5 + $0x5e4] ss:$8 sps:$4 sm:$0xff]  }
  0xdc   :  { %2460 = vmatpush2.bf16.msra.mxu0 %v3902_v58  ;;  %v3986_v58 = vld [vmem:[#allocation5 + $0x4e0] ss:$8 sps:$4 sm:$0xff]  }
  0xdd   :  { %2501 = vmatpush2.bf16.msra.mxu1 %v3905_v59  ;;  %2461 = vmatprep.subr.bf16.mxu0 %v3910_v60  ;;  %v3989_v59 = vld [vmem:[#allocation5 + $0x5e0] ss:$8 sps:$4 sm:$0xff]   ;;  %v3994_v60 = vld [vmem:[#allocation5 + $0x4d4] ss:$8 sps:$4 sm:$0xff]  }
  0xde   :  { %2502 = vmatprep.subr.bf16.mxu1 %v3913_v61  ;;  %v3997_v61 = vld [vmem:[#allocation5 + $0x5d4] ss:$8 sps:$4 sm:$0xff]  }
  0xe0   :  { %2462 = vmatpush2.bf16.msra.mxu0 %v3908_v62  ;;  %v3992_v62 = vld [vmem:[#allocation5 + $0x4d0] ss:$8 sps:$4 sm:$0xff]  }
  0xe1   :  { %2503 = vmatpush2.bf16.msra.mxu1 %v3911_v63  ;;  %2463 = vmatprep.subr.bf16.mxu0 %v3916_v0  ;;  %v3995_v63 = vld [vmem:[#allocation5 + $0x5d0] ss:$8 sps:$4 sm:$0xff]   ;;  %v4000_v0 = vld [vmem:[#allocation5 + $0x4c4] ss:$8 sps:$4 sm:$0xff]  }
  0xe2   :  { %2504 = vmatprep.subr.bf16.mxu1 %v3919_v1  ;;  %v4003_v1 = vld [vmem:[#allocation5 + $0x5c4] ss:$8 sps:$4 sm:$0xff]  }
  0xe4   :  { %2464 = vmatpush2.bf16.msra.mxu0 %v3914_v2  ;;  %v3998_v2 = vld [vmem:[#allocation5 + $0x4c0] ss:$8 sps:$4 sm:$0xff]  }
  0xe5   :  { %2505 = vmatpush2.bf16.msra.mxu1 %v3917_v3  ;;  %2465 = vmatprep.subr.bf16.mxu0 %v3922_v4  ;;  %v4001_v3 = vld [vmem:[#allocation5 + $0x5c0] ss:$8 sps:$4 sm:$0xff]   ;;  %v4006_v4 = vld [vmem:[#allocation5 + $0x4b4] ss:$8 sps:$4 sm:$0xff]  }
  0xe6   :  { %2506 = vmatprep.subr.bf16.mxu1 %v3925_v5  ;;  %v4009_v5 = vld [vmem:[#allocation5 + $0x5b4] ss:$8 sps:$4 sm:$0xff]  }
  0xe8   :  { %2466 = vmatpush2.bf16.msra.mxu0 %v3920_v6  ;;  %v4004_v6 = vld [vmem:[#allocation5 + $0x4b0] ss:$8 sps:$4 sm:$0xff]  }
  0xe9   :  { %2507 = vmatpush2.bf16.msra.mxu1 %v3923_v7  ;;  %2467 = vmatprep.subr.bf16.mxu0 %v3928_v8  ;;  %v4007_v7 = vld [vmem:[#allocation5 + $0x5b0] ss:$8 sps:$4 sm:$0xff]   ;;  %v4012_v8 = vld [vmem:[#allocation5 + $0x4a4] ss:$8 sps:$4 sm:$0xff]  }
  0xea   :  { %2508 = vmatprep.subr.bf16.mxu1 %v3931_v9  ;;  %v4015_v9 = vld [vmem:[#allocation5 + $0x5a4] ss:$8 sps:$4 sm:$0xff]  }
  0xec   :  { %2468 = vmatpush2.bf16.msra.mxu0 %v3926_v10  ;;  %v4010_v10 = vld [vmem:[#allocation5 + $0x4a0] ss:$8 sps:$4 sm:$0xff]  }
  0xed   :  { %2509 = vmatpush2.bf16.msra.mxu1 %v3929_v11  ;;  %2519 = vmatprep.subr.bf16.mxu0 %v3934_v13  ;;  %v4013_v11 = vld [vmem:[#allocation5 + $0x5a0] ss:$8 sps:$4 sm:$0xff]   ;;  %v4021_v13 = vld [vmem:[#allocation5 + $0x594] ss:$8 sps:$4 sm:$0xff]  }
  0xee   :  { %2560 = vmatprep.subr.bf16.mxu1 %v3937_v15  ;;  %v4019_v15 = vld [vmem:[#allocation5 + $0x590] ss:$8 sps:$4 sm:$0xff]  }
  0xef   :  { %2470 = vmatmul.mubr.bf16.vlgmr.msra.gmra.mxu0 %v171_v16  ;;  %v4024_v16 = vld [vmem:[#allocation5 + $0x484] ss:$8 sps:$4 sm:$0xff]  }
  0xf0   :  { %2511 = vmatmul.mubr.bf16.vlgmr.msra.gmra.mxu1 %v173_v18  ;;  %2520 = vmatpush1.bf16.msra.mxu0 %v3932_v17  ;;  %v4027_v17 = vld [vmem:[#allocation5 + $0x584] ss:$8 sps:$4 sm:$0xff]   ;;  %v4022_v18 = vld [vmem:[#allocation5 + $0x480] ss:$8 sps:$4 sm:$0xff]  }
  0xf1   :  { %2561 = vmatpush1.bf16.msra.mxu1 %v3935_v19  ;;  %2521 = vmatprep.subr.bf16.mxu0 %v3940_v20  ;;  %v4025_v19 = vld [vmem:[#allocation5 + $0x580] ss:$8 sps:$4 sm:$0xff]  }
  0xf2   :  { %2562 = vmatprep.subr.bf16.mxu1 %v3943_v21  ;;  %2551 = vmatprep.mubr.bf16.mxu0 %v176_v24  ;;  %v152_v20 = vld [vmem:[#allocation2 + $0x40] sm:$0xff]  ;;  %v4030_v21 = vld [vmem:[#allocation5 + $0x674] ss:$8 sps:$4 sm:$0xff]   ;;  %v4028_v24 = vld [vmem:[#allocation5 + $0x670] ss:$8 sps:$4 sm:$0xff]  }
  0xf3   :  { %2592 = vmatprep.mubr.bf16.mxu1 %v178_v29  ;;  %v159_v29 = vld [vmem:[#allocation2 + $0x78] sm:$0xff] }
  0xf4   :  { %2522 = vmatpush1.bf16.msra.mxu0 %v3938_v23  ;;  %v4033_v23 = vld [vmem:[#allocation5 + $0x774] ss:$8 sps:$4 sm:$0xff]  }
  0xf5   :  { %2563 = vmatpush1.bf16.msra.mxu1 %v3941_v25  ;;  %2523 = vmatprep.subr.bf16.mxu0 %v3946_v26  ;;  %v4031_v25 = vld [vmem:[#allocation5 + $0x770] ss:$8 sps:$4 sm:$0xff]   ;;  %v175_v26 = vpack.c.bf16 %v152_v20, %v152_v20  ;;  %v4114_v20 = vld [vmem:[#allocation5 + $0x694] ss:$8 sps:$4 sm:$0xff]  }
  0xf6   :  { %2564 = vmatprep.subr.bf16.mxu1 %v3949_v28  ;;  %v157_v28 = vld [vmem:[#allocation2 + $0x68] sm:$0xff] }
  0xf8   :  { %2524 = vmatpush1.bf16.msra.mxu0 %v3944_v30  ;;  %v4036_v30 = vld [vmem:[#allocation5 + $0x664] ss:$8 sps:$4 sm:$0xff]  }
  0xf9   :  { %2565 = vmatpush1.bf16.msra.mxu1 %v3947_v31  ;;  %2525 = vmatprep.subr.bf16.mxu0 %v3952_v32  ;;  %v4039_v31 = vld [vmem:[#allocation5 + $0x764] ss:$8 sps:$4 sm:$0xff]   ;;  %v180_v32 = vpack.c.bf16 %v157_v28, %v157_v28 }
  0xfa   :  { %2566 = vmatprep.subr.bf16.mxu1 %v3955_v33  ;;  %v182_v33 = vpack.c.bf16 %v159_v29, %v159_v29  ;;  %v156_v28 = vld [vmem:[#allocation2 + $0x60] sm:$0xff]  ;;  %v4126_v29 = vld [vmem:[#allocation5 + $0x874] ss:$8 sps:$4 sm:$0xff]  }
  0xfc   :  { %2526 = vmatpush1.bf16.msra.mxu0 %v3950_v34  ;;  %v4034_v34 = vld [vmem:[#allocation5 + $0x660] ss:$8 sps:$4 sm:$0xff]  }
  0xfd   :  { %2567 = vmatpush1.bf16.msra.mxu1 %v3953_v35  ;;  %2527 = vmatprep.subr.bf16.mxu0 %v3958_v36  ;;  %v4037_v35 = vld [vmem:[#allocation5 + $0x760] ss:$8 sps:$4 sm:$0xff]   ;;  %v4042_v36 = vld [vmem:[#allocation5 + $0x654] ss:$8 sps:$4 sm:$0xff]  }
  0xfe   :  { %2568 = vmatprep.subr.bf16.mxu1 %v3961_v37  ;;  %v4045_v37 = vld [vmem:[#allocation5 + $0x754] ss:$8 sps:$4 sm:$0xff]  }
 0x100   :  { %2528 = vmatpush1.bf16.msra.mxu0 %v3956_v38  ;;  %v4040_v38 = vld [vmem:[#allocation5 + $0x650] ss:$8 sps:$4 sm:$0xff]  }
 0x101   :  { %2569 = vmatpush1.bf16.msra.mxu1 %v3959_v39  ;;  %2529 = vmatprep.subr.bf16.mxu0 %v3964_v40  ;;  %v4043_v39 = vld [vmem:[#allocation5 + $0x750] ss:$8 sps:$4 sm:$0xff]   ;;  %v4048_v40 = vld [vmem:[#allocation5 + $0x644] ss:$8 sps:$4 sm:$0xff]  }
 0x102   :  { %2570 = vmatprep.subr.bf16.mxu1 %v3967_v41  ;;  %v4051_v41 = vld [vmem:[#allocation5 + $0x744] ss:$8 sps:$4 sm:$0xff]  }
 0x104   :  { %2530 = vmatpush1.bf16.msra.mxu0 %v3962_v42  ;;  %v4046_v42 = vld [vmem:[#allocation5 + $0x640] ss:$8 sps:$4 sm:$0xff]  }
 0x105   :  { %2571 = vmatpush1.bf16.msra.mxu1 %v3965_v43  ;;  %2531 = vmatprep.subr.bf16.mxu0 %v3970_v44  ;;  %v4049_v43 = vld [vmem:[#allocation5 + $0x740] ss:$8 sps:$4 sm:$0xff]   ;;  %v4054_v44 = vld [vmem:[#allocation5 + $0x634] ss:$8 sps:$4 sm:$0xff]  }
 0x106   :  { %2572 = vmatprep.subr.bf16.mxu1 %v3973_v45  ;;  %v4057_v45 = vld [vmem:[#allocation5 + $0x734] ss:$8 sps:$4 sm:$0xff]  }
 0x108   :  { %2532 = vmatpush1.bf16.msra.mxu0 %v3968_v46  ;;  %v4052_v46 = vld [vmem:[#allocation5 + $0x630] ss:$8 sps:$4 sm:$0xff]  }
 0x109   :  { %2573 = vmatpush1.bf16.msra.mxu1 %v3971_v47  ;;  %2533 = vmatprep.subr.bf16.mxu0 %v3976_v48  ;;  %v4055_v47 = vld [vmem:[#allocation5 + $0x730] ss:$8 sps:$4 sm:$0xff]   ;;  %v4060_v48 = vld [vmem:[#allocation5 + $0x624] ss:$8 sps:$4 sm:$0xff]  }
 0x10a   :  { %2574 = vmatprep.subr.bf16.mxu1 %v3979_v49  ;;  %v4063_v49 = vld [vmem:[#allocation5 + $0x724] ss:$8 sps:$4 sm:$0xff]  }
 0x10c   :  { %2534 = vmatpush1.bf16.msra.mxu0 %v3974_v50  ;;  %v4058_v50 = vld [vmem:[#allocation5 + $0x620] ss:$8 sps:$4 sm:$0xff]  }
 0x10d   :  { %2575 = vmatpush1.bf16.msra.mxu1 %v3977_v51  ;;  %2535 = vmatprep.subr.bf16.mxu0 %v3982_v52  ;;  %v4061_v51 = vld [vmem:[#allocation5 + $0x720] ss:$8 sps:$4 sm:$0xff]   ;;  %v4066_v52 = vld [vmem:[#allocation5 + $0x614] ss:$8 sps:$4 sm:$0xff]  }
 0x10e   :  { %2576 = vmatprep.subr.bf16.mxu1 %v3985_v53  ;;  %v4069_v53 = vld [vmem:[#allocation5 + $0x714] ss:$8 sps:$4 sm:$0xff]  }
 0x110   :  { %2536 = vmatpush2.bf16.msra.mxu0 %v3980_v54  ;;  %v4064_v54 = vld [vmem:[#allocation5 + $0x610] ss:$8 sps:$4 sm:$0xff]  }
 0x111   :  { %2577 = vmatpush2.bf16.msra.mxu1 %v3983_v55  ;;  %2537 = vmatprep.subr.bf16.mxu0 %v3988_v56  ;;  %v4067_v55 = vld [vmem:[#allocation5 + $0x710] ss:$8 sps:$4 sm:$0xff]   ;;  %v4072_v56 = vld [vmem:[#allocation5 + $0x604] ss:$8 sps:$4 sm:$0xff]  }
 0x112   :  { %2578 = vmatprep.subr.bf16.mxu1 %v3991_v57  ;;  %v4075_v57 = vld [vmem:[#allocation5 + $0x704] ss:$8 sps:$4 sm:$0xff]  }
 0x114   :  { %2538 = vmatpush2.bf16.msra.mxu0 %v3986_v58  ;;  %v4070_v58 = vld [vmem:[#allocation5 + $0x600] ss:$8 sps:$4 sm:$0xff]  }
 0x115   :  { %2579 = vmatpush2.bf16.msra.mxu1 %v3989_v59  ;;  %2539 = vmatprep.subr.bf16.mxu0 %v3994_v60  ;;  %v4073_v59 = vld [vmem:[#allocation5 + $0x700] ss:$8 sps:$4 sm:$0xff]   ;;  %v4078_v60 = vld [vmem:[#allocation5 + $0x6f4] ss:$8 sps:$4 sm:$0xff]  }
 0x116   :  { %2580 = vmatprep.subr.bf16.mxu1 %v3997_v61  ;;  %v4081_v61 = vld [vmem:[#allocation5 + $0x7f4] ss:$8 sps:$4 sm:$0xff]  }
 0x118   :  { %2540 = vmatpush2.bf16.msra.mxu0 %v3992_v62  ;;  %v4076_v62 = vld [vmem:[#allocation5 + $0x6f0] ss:$8 sps:$4 sm:$0xff]  }
 0x119   :  { %2581 = vmatpush2.bf16.msra.mxu1 %v3995_v63  ;;  %2541 = vmatprep.subr.bf16.mxu0 %v4000_v0  ;;  %v4079_v63 = vld [vmem:[#allocation5 + $0x7f0] ss:$8 sps:$4 sm:$0xff]   ;;  %v4084_v0 = vld [vmem:[#allocation5 + $0x6e4] ss:$8 sps:$4 sm:$0xff]  }
 0x11a   :  { %2582 = vmatprep.subr.bf16.mxu1 %v4003_v1  ;;  %v4087_v1 = vld [vmem:[#allocation5 + $0x7e4] ss:$8 sps:$4 sm:$0xff]  }
 0x11c   :  { %2542 = vmatpush2.bf16.msra.mxu0 %v3998_v2  ;;  %v4082_v2 = vld [vmem:[#allocation5 + $0x6e0] ss:$8 sps:$4 sm:$0xff]  }
 0x11d   :  { %2583 = vmatpush2.bf16.msra.mxu1 %v4001_v3  ;;  %2543 = vmatprep.subr.bf16.mxu0 %v4006_v4  ;;  %v4085_v3 = vld [vmem:[#allocation5 + $0x7e0] ss:$8 sps:$4 sm:$0xff]   ;;  %v4090_v4 = vld [vmem:[#allocation5 + $0x6d4] ss:$8 sps:$4 sm:$0xff]  }
 0x11e   :  { %2584 = vmatprep.subr.bf16.mxu1 %v4009_v5  ;;  %v4093_v5 = vld [vmem:[#allocation5 + $0x7d4] ss:$8 sps:$4 sm:$0xff]  }
 0x120   :  { %2544 = vmatpush2.bf16.msra.mxu0 %v4004_v6  ;;  %v4088_v6 = vld [vmem:[#allocation5 + $0x6d0] ss:$8 sps:$4 sm:$0xff]  }
 0x121   :  { %2585 = vmatpush2.bf16.msra.mxu1 %v4007_v7  ;;  %2545 = vmatprep.subr.bf16.mxu0 %v4012_v8  ;;  %v4091_v7 = vld [vmem:[#allocation5 + $0x7d0] ss:$8 sps:$4 sm:$0xff]   ;;  %v4096_v8 = vld [vmem:[#allocation5 + $0x6c4] ss:$8 sps:$4 sm:$0xff]  }
 0x122   :  { %2586 = vmatprep.subr.bf16.mxu1 %v4015_v9  ;;  %v4099_v9 = vld [vmem:[#allocation5 + $0x7c4] ss:$8 sps:$4 sm:$0xff]  }
 0x124   :  { %2546 = vmatpush2.bf16.msra.mxu0 %v4010_v10  ;;  %v4094_v10 = vld [vmem:[#allocation5 + $0x6c0] ss:$8 sps:$4 sm:$0xff]  }
 0x125   :  { %2587 = vmatpush2.bf16.msra.mxu1 %v4013_v11  ;;  %2547 = vmatprep.subr.bf16.mxu0 %v4018_v12  ;;  %v4097_v11 = vld [vmem:[#allocation5 + $0x7c0] ss:$8 sps:$4 sm:$0xff]   ;;  %v4102_v12 = vld [vmem:[#allocation5 + $0x6b4] ss:$8 sps:$4 sm:$0xff]  }
 0x126   :  { %2588 = vmatprep.subr.bf16.mxu1 %v4021_v13  ;;  %v4105_v13 = vld [vmem:[#allocation5 + $0x7b4] ss:$8 sps:$4 sm:$0xff]  }
 0x128   :  { %2548 = vmatpush2.bf16.msra.mxu0 %v4016_v14  ;;  %v4100_v14 = vld [vmem:[#allocation5 + $0x6b0] ss:$8 sps:$4 sm:$0xff]  }
 0x129   :  { %2589 = vmatpush2.bf16.msra.mxu1 %v4019_v15  ;;  %2549 = vmatprep.subr.bf16.mxu0 %v4024_v16  ;;  %v4103_v15 = vld [vmem:[#allocation5 + $0x7b0] ss:$8 sps:$4 sm:$0xff]   ;;  %v4108_v16 = vld [vmem:[#allocation5 + $0x6a4] ss:$8 sps:$4 sm:$0xff]  }
 0x12a   :  { %2590 = vmatprep.subr.bf16.mxu1 %v4027_v17  ;;  %v4111_v17 = vld [vmem:[#allocation5 + $0x7a4] ss:$8 sps:$4 sm:$0xff]  }
 0x12c   :  { %2550 = vmatpush2.bf16.msra.mxu0 %v4022_v18  ;;  %v4106_v18 = vld [vmem:[#allocation5 + $0x6a0] ss:$8 sps:$4 sm:$0xff]  }
 0x12d   :  { %2591 = vmatpush2.bf16.msra.mxu1 %v4025_v19  ;;  %2601 = vmatprep.subr.bf16.mxu0 %v4030_v21  ;;  %v4109_v19 = vld [vmem:[#allocation5 + $0x7a0] ss:$8 sps:$4 sm:$0xff]   ;;  %v4117_v21 = vld [vmem:[#allocation5 + $0x794] ss:$8 sps:$4 sm:$0xff]  }
 0x12e   :  { %2642 = vmatprep.subr.bf16.mxu1 %v4033_v23  ;;  %v4115_v23 = vld [vmem:[#allocation5 + $0x790] ss:$8 sps:$4 sm:$0xff]  }
 0x12f   :  { %2552 = vmatmul.mubr.bf16.vlgmr.msra.gmra.mxu0 %v175_v26  ;;  %v4118_v26 = vld [vmem:[#allocation5 + $0x680] ss:$8 sps:$4 sm:$0xff]  }
 0x130   :  { %2593 = vmatmul.mubr.bf16.vlgmr.msra.gmra.mxu1 %v177_v27  ;;  %2602 = vmatpush1.bf16.msra.mxu0 %v4028_v24  ;;  %v4120_v24 = vld [vmem:[#allocation5 + $0x684] ss:$8 sps:$4 sm:$0xff]   ;;  %v4121_v27 = vld [vmem:[#allocation5 + $0x780] ss:$8 sps:$4 sm:$0xff]  }
 0x131   :  { %2643 = vmatpush1.bf16.msra.mxu1 %v4031_v25  ;;  %2603 = vmatprep.subr.bf16.mxu0 %v4036_v30  ;;  %v4123_v25 = vld [vmem:[#allocation5 + $0x784] ss:$8 sps:$4 sm:$0xff]   ;;  %v158_v30 = vld [vmem:[#allocation2 + $0x70] sm:$0xff] }
 0x132   :  { %2644 = vmatprep.subr.bf16.mxu1 %v4039_v31  ;;  %2633 = vmatprep.mubr.bf16.mxu0 %v180_v32  ;;  %v4129_v31 = vld [vmem:[#allocation5 + $0x974] ss:$8 sps:$4 sm:$0xff]  }
 0x133   :  { %2674 = vmatprep.mubr.bf16.mxu1 %v182_v33  ;;  %v161_v32 = vld [vmem:[#allocation2 + $0x88] sm:$0xff] }
 0x134   :  { %2604 = vmatpush1.bf16.msra.mxu0 %v4034_v34  ;;  %v4124_v33 = vld [vmem:[#allocation5 + $0x870] ss:$8 sps:$4 sm:$0xff]  }
 0x135   :  { %2645 = vmatpush1.bf16.msra.mxu1 %v4037_v35  ;;  %2605 = vmatprep.subr.bf16.mxu0 %v4042_v36  ;;  %v4127_v34 = vld [vmem:[#allocation5 + $0x970] ss:$8 sps:$4 sm:$0xff]   ;;  %v179_v35 = vpack.c.bf16 %v156_v28, %v156_v28  ;;  %v181_v36 = vpack.c.bf16 %v158_v30, %v158_v30  ;;  %v4190_v28 = vld [vmem:[#allocation5 + $0x8c0] ss:$8 sps:$4 sm:$0xff]   ;;  %v4198_v30 = vld [vmem:[#allocation5 + $0x8b4] ss:$8 sps:$4 sm:$0xff]  }
 0x136   :  { %2646 = vmatprep.subr.bf16.mxu1 %v4045_v37  ;;  %v4132_v37 = vld [vmem:[#allocation5 + $0x864] ss:$8 sps:$4 sm:$0xff]  }
 0x138   :  { %2606 = vmatpush1.bf16.msra.mxu0 %v4040_v38  ;;  %v163_v38 = vld [vmem:[#allocation2 + $0x98] sm:$0xff] }
 0x139   :  { %2647 = vmatpush1.bf16.msra.mxu1 %v4043_v39  ;;  %2607 = vmatprep.subr.bf16.mxu0 %v4048_v40  ;;  %v4135_v39 = vld [vmem:[#allocation5 + $0x964] ss:$8 sps:$4 sm:$0xff]   ;;  %v4130_v40 = vld [vmem:[#allocation5 + $0x860] ss:$8 sps:$4 sm:$0xff]  }
 0x13a   :  { %2648 = vmatprep.subr.bf16.mxu1 %v4051_v41  ;;  %v4133_v41 = vld [vmem:[#allocation5 + $0x960] ss:$8 sps:$4 sm:$0xff]  }
 0x13c   :  { %2608 = vmatpush1.bf16.msra.mxu0 %v4046_v42  ;;  %v184_v42 = vpack.c.bf16 %v161_v32, %v161_v32  ;;  %v4196_v32 = vld [vmem:[#allocation5 + $0x8b0] ss:$8 sps:$4 sm:$0xff]  }
 0x13d   :  { %2649 = vmatpush1.bf16.msra.mxu1 %v4049_v43  ;;  %2609 = vmatprep.subr.bf16.mxu0 %v4054_v44  ;;  %v186_v43 = vpack.c.bf16 %v163_v38, %v163_v38  ;;  %v4210_v38 = vld [vmem:[#allocation5 + $0x894] ss:$8 sps:$4 sm:$0xff]  }
 0x13e   :  { %2650 = vmatprep.subr.bf16.mxu1 %v4057_v45 }
 0x140   :  { %2610 = vmatpush1.bf16.msra.mxu0 %v4052_v46  ;;  %v4138_v46 = vld [vmem:[#allocation5 + $0x854] ss:$8 sps:$4 sm:$0xff]  }
 0x141   :  { %2651 = vmatpush1.bf16.msra.mxu1 %v4055_v47  ;;  %2611 = vmatprep.subr.bf16.mxu0 %v4060_v48  ;;  %v4141_v47 = vld [vmem:[#allocation5 + $0x954] ss:$8 sps:$4 sm:$0xff]  }
 0x142   :  { %2652 = vmatprep.subr.bf16.mxu1 %v4063_v49 }
 0x144   :  { %2612 = vmatpush1.bf16.msra.mxu0 %v4058_v50 }
 0x145   :  { %2653 = vmatpush1.bf16.msra.mxu1 %v4061_v51  ;;  %2613 = vmatprep.subr.bf16.mxu0 %v4066_v52 }
 0x146   :  { %2654 = vmatprep.subr.bf16.mxu1 %v4069_v53 }
 0x148   :  { %2614 = vmatpush1.bf16.msra.mxu0 %v4064_v54  ;;  %v4136_v54 = vld [vmem:[#allocation5 + $0x850] ss:$8 sps:$4 sm:$0xff]  }
 0x149   :  { %2655 = vmatpush1.bf16.msra.mxu1 %v4067_v55  ;;  %2615 = vmatprep.subr.bf16.mxu0 %v4072_v56  ;;  %v4139_v55 = vld [vmem:[#allocation5 + $0x950] ss:$8 sps:$4 sm:$0xff]  }
 0x14a   :  { %2656 = vmatprep.subr.bf16.mxu1 %v4075_v57  ;;  %v4144_v57 = vld [vmem:[#allocation5 + $0x844] ss:$8 sps:$4 sm:$0xff]  }
 0x14c   :  { %2616 = vmatpush1.bf16.msra.mxu0 %v4070_v58  ;;  %v4147_v58 = vld [vmem:[#allocation5 + $0x944] ss:$8 sps:$4 sm:$0xff]  }
 0x14d   :  { %2657 = vmatpush1.bf16.msra.mxu1 %v4073_v59  ;;  %2617 = vmatprep.subr.bf16.mxu0 %v4078_v60  ;;  %v4142_v60 = vld [vmem:[#allocation5 + $0x840] ss:$8 sps:$4 sm:$0xff]  }
 0x14e   :  { %2658 = vmatprep.subr.bf16.mxu1 %v4081_v61  ;;  %v4145_v61 = vld [vmem:[#allocation5 + $0x940] ss:$8 sps:$4 sm:$0xff]  }
 0x150   :  { %2618 = vmatpush2.bf16.msra.mxu0 %v4076_v62  ;;  %v4150_v62 = vld [vmem:[#allocation5 + $0x834] ss:$8 sps:$4 sm:$0xff]  }
 0x151   :  { %2659 = vmatpush2.bf16.msra.mxu1 %v4079_v63  ;;  %2619 = vmatprep.subr.bf16.mxu0 %v4084_v0  ;;  %v4153_v63 = vld [vmem:[#allocation5 + $0x934] ss:$8 sps:$4 sm:$0xff]   ;;  %v4148_v0 = vld [vmem:[#allocation5 + $0x830] ss:$8 sps:$4 sm:$0xff]  }
 0x152   :  { %2660 = vmatprep.subr.bf16.mxu1 %v4087_v1  ;;  %v4151_v1 = vld [vmem:[#allocation5 + $0x930] ss:$8 sps:$4 sm:$0xff]  }
 0x154   :  { %2620 = vmatpush2.bf16.msra.mxu0 %v4082_v2  ;;  %v4156_v2 = vld [vmem:[#allocation5 + $0x824] ss:$8 sps:$4 sm:$0xff]  }
 0x155   :  { %2661 = vmatpush2.bf16.msra.mxu1 %v4085_v3  ;;  %2621 = vmatprep.subr.bf16.mxu0 %v4090_v4  ;;  %v4159_v3 = vld [vmem:[#allocation5 + $0x924] ss:$8 sps:$4 sm:$0xff]   ;;  %v4154_v4 = vld [vmem:[#allocation5 + $0x820] ss:$8 sps:$4 sm:$0xff]  }
 0x156   :  { %2662 = vmatprep.subr.bf16.mxu1 %v4093_v5  ;;  %v4157_v5 = vld [vmem:[#allocation5 + $0x920] ss:$8 sps:$4 sm:$0xff]  }
 0x158   :  { %2622 = vmatpush2.bf16.msra.mxu0 %v4088_v6  ;;  %v4162_v6 = vld [vmem:[#allocation5 + $0x814] ss:$8 sps:$4 sm:$0xff]  }
 0x159   :  { %2663 = vmatpush2.bf16.msra.mxu1 %v4091_v7  ;;  %2623 = vmatprep.subr.bf16.mxu0 %v4096_v8  ;;  %v4165_v7 = vld [vmem:[#allocation5 + $0x914] ss:$8 sps:$4 sm:$0xff]   ;;  %v4160_v8 = vld [vmem:[#allocation5 + $0x810] ss:$8 sps:$4 sm:$0xff]  }
 0x15a   :  { %2664 = vmatprep.subr.bf16.mxu1 %v4099_v9  ;;  %v4163_v9 = vld [vmem:[#allocation5 + $0x910] ss:$8 sps:$4 sm:$0xff]  }
 0x15c   :  { %2624 = vmatpush2.bf16.msra.mxu0 %v4094_v10  ;;  %v4168_v10 = vld [vmem:[#allocation5 + $0x804] ss:$8 sps:$4 sm:$0xff]  }
 0x15d   :  { %2665 = vmatpush2.bf16.msra.mxu1 %v4097_v11  ;;  %2625 = vmatprep.subr.bf16.mxu0 %v4102_v12  ;;  %v4171_v11 = vld [vmem:[#allocation5 + $0x904] ss:$8 sps:$4 sm:$0xff]   ;;  %v4166_v12 = vld [vmem:[#allocation5 + $0x800] ss:$8 sps:$4 sm:$0xff]  }
 0x15e   :  { %2666 = vmatprep.subr.bf16.mxu1 %v4105_v13  ;;  %v4169_v13 = vld [vmem:[#allocation5 + $0x900] ss:$8 sps:$4 sm:$0xff]  }
 0x160   :  { %2626 = vmatpush2.bf16.msra.mxu0 %v4100_v14  ;;  %v4174_v14 = vld [vmem:[#allocation5 + $0x8f4] ss:$8 sps:$4 sm:$0xff]  }
 0x161   :  { %2667 = vmatpush2.bf16.msra.mxu1 %v4103_v15  ;;  %2627 = vmatprep.subr.bf16.mxu0 %v4108_v16  ;;  %v4177_v15 = vld [vmem:[#allocation5 + $0x9f4] ss:$8 sps:$4 sm:$0xff]   ;;  %v4172_v16 = vld [vmem:[#allocation5 + $0x8f0] ss:$8 sps:$4 sm:$0xff]  }
 0x162   :  { %2668 = vmatprep.subr.bf16.mxu1 %v4111_v17  ;;  %v4175_v17 = vld [vmem:[#allocation5 + $0x9f0] ss:$8 sps:$4 sm:$0xff]  }
 0x164   :  { %2628 = vmatpush2.bf16.msra.mxu0 %v4106_v18  ;;  %v4180_v18 = vld [vmem:[#allocation5 + $0x8e4] ss:$8 sps:$4 sm:$0xff]  }
 0x165   :  { %2669 = vmatpush2.bf16.msra.mxu1 %v4109_v19  ;;  %2629 = vmatprep.subr.bf16.mxu0 %v4114_v20  ;;  %v4183_v19 = vld [vmem:[#allocation5 + $0x9e4] ss:$8 sps:$4 sm:$0xff]   ;;  %v4178_v20 = vld [vmem:[#allocation5 + $0x8e0] ss:$8 sps:$4 sm:$0xff]  }
 0x166   :  { %2670 = vmatprep.subr.bf16.mxu1 %v4117_v21  ;;  %v4181_v21 = vld [vmem:[#allocation5 + $0x9e0] ss:$8 sps:$4 sm:$0xff]  }
 0x168   :  { %2630 = vmatpush2.bf16.msra.mxu0 %v4112_v22  ;;  %v4186_v22 = vld [vmem:[#allocation5 + $0x8d4] ss:$8 sps:$4 sm:$0xff]  }
 0x169   :  { %2671 = vmatpush2.bf16.msra.mxu1 %v4115_v23  ;;  %2631 = vmatprep.subr.bf16.mxu0 %v4120_v24  ;;  %v4189_v23 = vld [vmem:[#allocation5 + $0x9d4] ss:$8 sps:$4 sm:$0xff]   ;;  %v4184_v24 = vld [vmem:[#allocation5 + $0x8d0] ss:$8 sps:$4 sm:$0xff]  }
 0x16a   :  { %2672 = vmatprep.subr.bf16.mxu1 %v4123_v25  ;;  %v4187_v25 = vld [vmem:[#allocation5 + $0x9d0] ss:$8 sps:$4 sm:$0xff]  }
 0x16c   :  { %2632 = vmatpush2.bf16.msra.mxu0 %v4118_v26  ;;  %v4192_v26 = vld [vmem:[#allocation5 + $0x8c4] ss:$8 sps:$4 sm:$0xff]  }
 0x16d   :  { %2673 = vmatpush2.bf16.msra.mxu1 %v4121_v27  ;;  %2683 = vmatprep.subr.bf16.mxu0 %v4126_v29  ;;  %v4195_v27 = vld [vmem:[#allocation5 + $0x9c4] ss:$8 sps:$4 sm:$0xff]   ;;  %v4193_v29 = vld [vmem:[#allocation5 + $0x9c0] ss:$8 sps:$4 sm:$0xff]  }
 0x16e   :  { %2724 = vmatprep.subr.bf16.mxu1 %v4129_v31  ;;  %v4201_v31 = vld [vmem:[#allocation5 + $0x9b4] ss:$8 sps:$4 sm:$0xff]  }
 0x16f   :  { %v2389_v44 = vpop.f32.mrf.mxu0  ;;  %2634 = vmatmul.mubr.bf16.vlgmr.msra.gmra.mxu0 %v179_v35  ;;  %v4207_v35 = vld [vmem:[#allocation5 + $0x9a4] ss:$8 sps:$4 sm:$0xff]  }
 0x170   :  { %v2430_v45 = vpop.f32.mrf.mxu1  ;;  %2675 = vmatmul.mubr.bf16.vlgmr.msra.gmra.mxu1 %v181_v36  ;;  %2684 = vmatpush1.bf16.msra.mxu0 %v4124_v33  ;;  %v4199_v33 = vld [vmem:[#allocation5 + $0x9b0] ss:$8 sps:$4 sm:$0xff]   ;;  %v4202_v36 = vld [vmem:[#allocation5 + $0x8a0] ss:$8 sps:$4 sm:$0xff]  }
 0x171   :  { %v4626_v48 = vadd.f32 %v2430_v45, %v2389_v44  ;;  %2725 = vmatpush1.bf16.msra.mxu1 %v4127_v34  ;;  %v2391_v49 = vpop.f32.mrf.mxu0  ;;  %2685 = vmatprep.subr.bf16.mxu0 %v4132_v37  ;;  %v4204_v34 = vld [vmem:[#allocation5 + $0x8a4] ss:$8 sps:$4 sm:$0xff]   ;;  %v4205_v37 = vld [vmem:[#allocation5 + $0x9a0] ss:$8 sps:$4 sm:$0xff]   ;;  %v548_v44 = vld [vmem:[#allocation5 + $0xb30] sm:$0x77] }
 0x172   :  { %v2432_v50 = vpop.f32.mrf.mxu1  ;;  %2726 = vmatprep.subr.bf16.mxu1 %v4135_v39  ;;  %2715 = vmatprep.mubr.bf16.mxu0 %v184_v42  ;;  %v4213_v39 = vld [vmem:[#allocation5 + $0x994] ss:$8 sps:$4 sm:$0xff]   ;;  %v4216_v42 = vld [vmem:[#allocation5 + $0x884] ss:$8 sps:$4 sm:$0xff]   ;;  %v4214_v45 = vld [vmem:[#allocation5 + $0x880] ss:$8 sps:$4 sm:$0xff]  }
 0x173   :  { %v4628_v51 = vadd.f32 %v2432_v50, %v2391_v49  ;;  %2756 = vmatprep.mubr.bf16.mxu1 %v186_v43  ;;  %v2393_v52 = vpop.f32.mrf.mxu0  ;;  %v4219_v43 = vld [vmem:[#allocation5 + $0x984] ss:$8 sps:$4 sm:$0xff]   ;;  %v162_v49 = vld [vmem:[#allocation2 + $0x90] sm:$0xff] }
 0x174   :  { %v2434_v53 = vpop.f32.mrf.mxu1  ;;  %2686 = vmatpush1.bf16.msra.mxu0 %v4130_v40  ;;  %v4208_v40 = vld [vmem:[#allocation5 + $0x890] ss:$8 sps:$4 sm:$0xff]   ;;  %v4222_v50 = vld [vmem:[#allocation5 + $0xa74] ss:$8 sps:$4 sm:$0xff]   ;;  %v3642_v52 = vcombine.high %v548_v44, %v548_v44 }
 0x175   :  { %2727 = vmatpush1.bf16.msra.mxu1 %v4133_v41  ;;  %v2394_v56 = vpop.f32.mrf.mxu0  ;;  %2687 = vmatprep.subr.bf16.mxu0 %v4138_v46  ;;  %v4211_v41 = vld [vmem:[#allocation5 + $0x990] ss:$8 sps:$4 sm:$0xff]   ;;  %v4217_v46 = vld [vmem:[#allocation5 + $0x980] ss:$8 sps:$4 sm:$0xff]   ;;  %v3641_v53 = vcombine.low %v548_v44, %v548_v44 }
 0x176   :  { %2728 = vmatprep.subr.bf16.mxu1 %v4141_v47  ;;  %v2435_v59 = vpop.f32.mrf.mxu1  ;;  %v160_v47 = vld [vmem:[#allocation2 + $0x80] sm:$0xff]  ;;  %v165_v56 = vld [vmem:[#allocation2 + $0xa8] sm:$0xff] }
 0x177   :  { %v2350_v59 = vsel %vm2348_vm0, %v3641_v53, 0  ;;  %v4276_v44 = vld [vmem:[#allocation5 + $0xa80] ss:$8 sps:$4 sm:$0xff]  }
 0x178   :  { %2688 = vmatpush1.bf16.msra.mxu0 %v4136_v54  ;;  %v183_v54 = vpack.c.bf16 %v160_v47, %v160_v47 }
 0x179   :  { %2729 = vmatpush1.bf16.msra.mxu1 %v4139_v55  ;;  %2689 = vmatprep.subr.bf16.mxu0 %v4144_v57  ;;  %v185_v55 = vpack.c.bf16 %v162_v49, %v162_v49  ;;  %v4220_v57 = vld [vmem:[#allocation5 + $0xa70] ss:$8 sps:$4 sm:$0xff]  }
 0x17a   :  { %2730 = vmatprep.subr.bf16.mxu1 %v4147_v58  ;;  %v4225_v58 = vld [vmem:[#allocation5 + $0xa64] ss:$8 sps:$4 sm:$0xff]  }
 0x17c   :  { %2690 = vmatpush1.bf16.msra.mxu0 %v4142_v60  ;;  %v4263_v60 = vld [vmem:[#allocation5 + $0xb24] ss:$8 sps:$4 sm:$0xff]  }
 0x17d   :  { %2731 = vmatpush1.bf16.msra.mxu1 %v4145_v61  ;;  %2691 = vmatprep.subr.bf16.mxu0 %v4150_v62  ;;  %v188_v61 = vpack.c.bf16 %v165_v56, %v165_v56 }
 0x17e   :  { %2732 = vmatprep.subr.bf16.mxu1 %v4153_v63 }
 0x180   :  { %2692 = vmatpush1.bf16.msra.mxu0 %v4148_v0 }
 0x181   :  { %2733 = vmatpush1.bf16.msra.mxu1 %v4151_v1  ;;  %2693 = vmatprep.subr.bf16.mxu0 %v4156_v2  ;;  %v4223_v1 = vld [vmem:[#allocation5 + $0xa60] ss:$8 sps:$4 sm:$0xff]  }
 0x182   :  { %2734 = vmatprep.subr.bf16.mxu1 %v4159_v3  ;;  %v4261_v2 = vld [vmem:[#allocation5 + $0xb20] ss:$8 sps:$4 sm:$0xff]  }
 0x184   :  { %2694 = vmatpush1.bf16.msra.mxu0 %v4154_v4 }
 0x185   :  { %2735 = vmatpush1.bf16.msra.mxu1 %v4157_v5  ;;  %2695 = vmatprep.subr.bf16.mxu0 %v4162_v6  ;;  %v4228_v5 = vld [vmem:[#allocation5 + $0xa54] ss:$8 sps:$4 sm:$0xff]  }
 0x186   :  { %2736 = vmatprep.subr.bf16.mxu1 %v4165_v7  ;;  %v4269_v6 = vld [vmem:[#allocation5 + $0xb14] ss:$8 sps:$4 sm:$0xff]  }
 0x188   :  { %2696 = vmatpush1.bf16.msra.mxu0 %v4160_v8 }
 0x189   :  { %2737 = vmatpush1.bf16.msra.mxu1 %v4163_v9  ;;  %2697 = vmatprep.subr.bf16.mxu0 %v4168_v10  ;;  %v4538_v9 = vmov 0  }
 0x18a   :  { %2738 = vmatprep.subr.bf16.mxu1 %v4171_v11 }
 0x18c   :  { %2698 = vmatpush1.bf16.msra.mxu0 %v4166_v12  ;;  %v4226_v12 = vld [vmem:[#allocation5 + $0xa50] ss:$8 sps:$4 sm:$0xff]  }
 0x18d   :  { %2739 = vmatpush1.bf16.msra.mxu1 %v4169_v13  ;;  %2699 = vmatprep.subr.bf16.mxu0 %v4174_v14  ;;  %v4267_v13 = vld [vmem:[#allocation5 + $0xb10] ss:$8 sps:$4 sm:$0xff]  }
 0x18e   :  { %2740 = vmatprep.subr.bf16.mxu1 %v4177_v15  ;;  %v4231_v15 = vld [vmem:[#allocation5 + $0xa44] ss:$8 sps:$4 sm:$0xff]  }
 0x190   :  { %2700 = vmatpush2.bf16.msra.mxu0 %v4172_v16 }
 0x191   :  { %2741 = vmatpush2.bf16.msra.mxu1 %v4175_v17  ;;  %2701 = vmatprep.subr.bf16.mxu0 %v4180_v18  ;;  %v4275_v17 = vld [vmem:[#allocation5 + $0xb04] ss:$8 sps:$4 sm:$0xff]   ;;  %v4273_v18 = vld [vmem:[#allocation5 + $0xb00] ss:$8 sps:$4 sm:$0xff]  }
 0x192   :  { %2742 = vmatprep.subr.bf16.mxu1 %v4183_v19  ;;  %v166_v19 = vld [vmem:[#allocation2 + $0xb0] sm:$0xff] }
 0x194   :  { %2702 = vmatpush2.bf16.msra.mxu0 %v4178_v20  ;;  %v4234_v20 = vld [vmem:[#allocation5 + $0xa34] ss:$8 sps:$4 sm:$0xff]  }
 0x195   :  { %2743 = vmatpush2.bf16.msra.mxu1 %v4181_v21  ;;  %2703 = vmatprep.subr.bf16.mxu0 %v4186_v22  ;;  %v189_v21 = vpack.c.bf16 %v166_v19, %v166_v19  ;;  %v4232_v22 = vld [vmem:[#allocation5 + $0xa30] ss:$8 sps:$4 sm:$0xff]   ;;  %v4291_v19 = vld [vmem:[#allocation10 + $0x48] sm:$0xff]  }
 0x196   :  { %2744 = vmatprep.subr.bf16.mxu1 %v4189_v23  ;;  %v4237_v23 = vld [vmem:[#allocation5 + $0xa24] ss:$8 sps:$4 sm:$0xff]  }
 0x198   :  { %2704 = vmatpush2.bf16.msra.mxu0 %v4184_v24  ;;  %v4235_v24 = vld [vmem:[#allocation5 + $0xa20] ss:$8 sps:$4 sm:$0xff]  }
 0x199   :  { %2745 = vmatpush2.bf16.msra.mxu1 %v4187_v25  ;;  %2705 = vmatprep.subr.bf16.mxu0 %v4192_v26  ;;  %v4240_v25 = vld [vmem:[#allocation5 + $0xa14] ss:$8 sps:$4 sm:$0xff]   ;;  %v4238_v26 = vld [vmem:[#allocation5 + $0xa10] ss:$8 sps:$4 sm:$0xff]  }
 0x19a   :  { %2746 = vmatprep.subr.bf16.mxu1 %v4195_v27  ;;  %v4243_v27 = vld [vmem:[#allocation5 + $0xa04] ss:$8 sps:$4 sm:$0xff]  }
 0x19c   :  { %2706 = vmatpush2.bf16.msra.mxu0 %v4190_v28  ;;  %v4241_v28 = vld [vmem:[#allocation5 + $0xa00] ss:$8 sps:$4 sm:$0xff]  }
 0x19d   :  { %2747 = vmatpush2.bf16.msra.mxu1 %v4193_v29  ;;  %2707 = vmatprep.subr.bf16.mxu0 %v4198_v30  ;;  %v4246_v29 = vld [vmem:[#allocation5 + $0xaf4] ss:$8 sps:$4 sm:$0xff]   ;;  %v4244_v30 = vld [vmem:[#allocation5 + $0xaf0] ss:$8 sps:$4 sm:$0xff]  }
 0x19e   :  { %2748 = vmatprep.subr.bf16.mxu1 %v4201_v31  ;;  %v4249_v31 = vld [vmem:[#allocation5 + $0xae4] ss:$8 sps:$4 sm:$0xff]  }
 0x1a0   :  { %2708 = vmatpush2.bf16.msra.mxu0 %v4196_v32  ;;  %v4247_v32 = vld [vmem:[#allocation5 + $0xae0] ss:$8 sps:$4 sm:$0xff]  }
 0x1a1   :  { %2749 = vmatpush2.bf16.msra.mxu1 %v4199_v33  ;;  %2709 = vmatprep.subr.bf16.mxu0 %v4204_v34  ;;  %v4252_v33 = vld [vmem:[#allocation5 + $0xad4] ss:$8 sps:$4 sm:$0xff]   ;;  %v4250_v34 = vld [vmem:[#allocation5 + $0xad0] ss:$8 sps:$4 sm:$0xff]  }
 0x1a2   :  { %2750 = vmatprep.subr.bf16.mxu1 %v4207_v35  ;;  %v4255_v35 = vld [vmem:[#allocation5 + $0xac4] ss:$8 sps:$4 sm:$0xff]  }
 0x1a4   :  { %2710 = vmatpush2.bf16.msra.mxu0 %v4202_v36  ;;  %v4253_v36 = vld [vmem:[#allocation5 + $0xac0] ss:$8 sps:$4 sm:$0xff]  }
 0x1a5   :  { %2751 = vmatpush2.bf16.msra.mxu1 %v4205_v37  ;;  %2711 = vmatprep.subr.bf16.mxu0 %v4210_v38  ;;  %v4260_v37 = vld [vmem:[#allocation5 + $0xab4] ss:$8 sps:$4 sm:$0xff]   ;;  %v4258_v38 = vld [vmem:[#allocation5 + $0xab0] ss:$8 sps:$4 sm:$0xff]  }
 0x1a6   :  { %2752 = vmatprep.subr.bf16.mxu1 %v4213_v39  ;;  %v4266_v39 = vld [vmem:[#allocation5 + $0xaa4] ss:$8 sps:$4 sm:$0xff]  }
 0x1a8   :  { %2712 = vmatpush2.bf16.msra.mxu0 %v4208_v40  ;;  %v4264_v40 = vld [vmem:[#allocation5 + $0xaa0] ss:$8 sps:$4 sm:$0xff]  }
 0x1a9   :  { %2753 = vmatpush2.bf16.msra.mxu1 %v4211_v41  ;;  %2713 = vmatprep.subr.bf16.mxu0 %v4216_v42  ;;  %v4272_v41 = vld [vmem:[#allocation5 + $0xa94] ss:$8 sps:$4 sm:$0xff]   ;;  %v4270_v42 = vld [vmem:[#allocation5 + $0xa90] ss:$8 sps:$4 sm:$0xff]  }
 0x1aa   :  { %2754 = vmatprep.subr.bf16.mxu1 %v4219_v43  ;;  %v4278_v43 = vld [vmem:[#allocation5 + $0xa84] ss:$8 sps:$4 sm:$0xff]  }
 0x1ac   :  { %2714 = vmatpush2.bf16.msra.mxu0 %v4214_v45  ;;  %v164_v45 = vld [vmem:[#allocation2 + $0xa0] sm:$0xff] }
 0x1ad   :  { %2755 = vmatpush2.bf16.msra.mxu1 %v4217_v46  ;;  %2765 = vmatprep.subr.bf16.mxu0 %v4222_v50  ;;  %v187_v46 = vpack.c.bf16 %v164_v45, %v164_v45 }
 0x1ae   :  { %3643 = vmatprep.subr.msk.bf16.mxu1 %vm2348_vm0, %v3642_v52 }
 0x1af   :  { %v2471_v62 = vpop.f32.mrf.mxu0  ;;  %2716 = vmatmul.mubr.bf16.vlgmr.msra.gmra.mxu0 %v183_v54 }
 0x1b0   :  { %v2512_v63 = vpop.f32.mrf.mxu1  ;;  %2757 = vmatmul.mubr.bf16.vlgmr.msra.gmra.mxu1 %v185_v55  ;;  %v2472_v0 = vadd.f32 %v2471_v62, %v4626_v48  ;;  %2766 = vmatpush1.bf16.msra.mxu0 %v4220_v57 }
 0x1b1   :  { %2815 = vmatpush1.bf16.msra.mxu1 %v2350_v59  ;;  %v2473_v3 = vpop.f32.mrf.mxu0  ;;  %2767 = vmatprep.subr.bf16.mxu0 %v4225_v58 }
 0x1b2   :  { %v2514_v4 = vpop.f32.mrf.mxu1  ;;  %2816 = vmatprep.subr.bf16.mxu1 %v4263_v60  ;;  %v2474_v7 = vadd.f32 %v2473_v3, %v4628_v51  ;;  %v4632_v8 = vadd.f32 %v2512_v63, %v2472_v0  ;;  %2838 = vmatprep.mubr.bf16.mxu1 %v4538_v9  ;;  %v4229_v51 = vld [vmem:[#allocation5 + $0xa40] ss:$8 sps:$4 sm:$0xff]   ;;  %v4279_v9 = vld [vmem:[#allocation10 + $0x78] sm:$0xff]  }
 0x1b3   :  { %2797 = vmatprep.mubr.bf16.mxu0 %v188_v61  ;;  %v2475_v10 = vpop.f32.mrf.mxu0 }
 0x1b4   :  { %v2516_v11 = vpop.f32.mrf.mxu1  ;;  %v4634_v48 = vadd.f32 %v2514_v4, %v2474_v7  ;;  %2768 = vmatpush1.bf16.msra.mxu0 %v4223_v1  ;;  %v4280_v10 = vld [vmem:[#allocation10 + $0x38] sm:$0xff]  }
 0x1b5   :  { %2817 = vmatpush1.bf16.msra.mxu1 %v4261_v2  ;;  %v2476_v14 = vpop.f32.mrf.mxu0  ;;  %2769 = vmatprep.subr.bf16.mxu0 %v4228_v5  ;;  %v4281_v11 = vld [vmem:[#allocation10 + $0x70] sm:$0xff]  }
 0x1b6   :  { %v2517_v16 = vpop.f32.mrf.mxu1  ;;  %2818 = vmatprep.subr.bf16.mxu1 %v4269_v6  ;;  %v4285_v14 = vld [vmem:[#allocation10 + $0x60] sm:$0xff]  }
 0x1b7   :  { %v4287_v16 = vld [vmem:[#allocation10 + $0x58] sm:$0xff]  }
 0x1b8   :  { %2770 = vmatpush1.bf16.msra.mxu0 %v4226_v12  ;;  %v4283_v12 = vld [vmem:[#allocation10 + $0x68] sm:$0xff]  }
 0x1b9   :  { %2819 = vmatpush1.bf16.msra.mxu1 %v4267_v13  ;;  %2771 = vmatprep.subr.bf16.mxu0 %v4231_v15  ;;  %v4284_v13 = vld [vmem:[#allocation10 + $0x28] sm:$0xff]   ;;  %v4286_v15 = vld [vmem:[#allocation10 + $0x20] sm:$0xff]  }
 0x1ba   :  { %2820 = vmatprep.subr.bf16.mxu1 %v4275_v17  ;;  %v4288_v17 = vld [vmem:[#allocation10 + $0x18] sm:$0xff]  }
 0x1bc   :  { %2772 = vmatpush1.bf16.msra.mxu0 %v4229_v51  ;;  %v4289_v51 = vld [vmem:[#allocation10 + $0x50] sm:$0xff]  }
 0x1bd   :  { %2821 = vmatpush1.bf16.msra.mxu1 %v4273_v18  ;;  %2773 = vmatprep.subr.bf16.mxu0 %v4234_v20  ;;  %v4290_v18 = vld [vmem:[#allocation10 + $0x10] sm:$0xff]   ;;  %v4292_v20 = vld [vmem:[#allocation10 + $0x8] sm:$0xff]  }
 0x1be   :  { %3671 = vmatprep.subr.bf16.mxu1 %v4279_v9 }
 0x1c0   :  { %3644 = vmatmul.mubr.msk.bf16.vlgmr.msra.gmra.mxu1 %vm2344_vm1, %v189_v21  ;;  %2774 = vmatpush1.bf16.msra.mxu0 %v4232_v22 }
 0x1c1   :  { %2775 = vmatprep.subr.bf16.mxu0 %v4237_v23  ;;  %3672 = vmatpush3.bf16.msra.mxu1 %v4280_v10  ;;  %v4293_v23 = vld [vmem:[#allocation10 + $0x40] sm:$0xff]  }
 0x1c2   :  { %3673 = vmatprep.subr.bf16.mxu1 %v4281_v11 }
 0x1c4   :  { %2776 = vmatpush1.bf16.msra.mxu0 %v4235_v24 }
 0x1c5   :  { %2777 = vmatprep.subr.bf16.mxu0 %v4240_v25 }
 0x1c8   :  { %2778 = vmatpush1.bf16.msra.mxu0 %v4238_v26 }
 0x1c9   :  { %2779 = vmatprep.subr.bf16.mxu0 %v4243_v27 }
 0x1cc   :  { %2780 = vmatpush1.bf16.msra.mxu0 %v4241_v28  ;;  %v4294_v28 = vld [vmem:[#allocation10] sm:$0xff]  }
 0x1cd   :  { %2781 = vmatprep.subr.bf16.mxu0 %v4246_v29 }
 0x1d0   :  { %2782 = vmatpush2.bf16.msra.mxu0 %v4244_v30 }
 0x1d1   :  { %2783 = vmatprep.subr.bf16.mxu0 %v4249_v31 }
 0x1d4   :  { %2784 = vmatpush2.bf16.msra.mxu0 %v4247_v32 }
 0x1d5   :  { %2785 = vmatprep.subr.bf16.mxu0 %v4252_v33 }
 0x1d8   :  { %2786 = vmatpush2.bf16.msra.mxu0 %v4250_v34 }
 0x1d9   :  { %2787 = vmatprep.subr.bf16.mxu0 %v4255_v35 }
 0x1dc   :  { %2788 = vmatpush2.bf16.msra.mxu0 %v4253_v36 }
 0x1dd   :  { %2789 = vmatprep.subr.bf16.mxu0 %v4260_v37 }
 0x1e0   :  { %2790 = vmatpush2.bf16.msra.mxu0 %v4258_v38 }
 0x1e1   :  { %2791 = vmatprep.subr.bf16.mxu0 %v4266_v39 }
 0x1e4   :  { %2792 = vmatpush2.bf16.msra.mxu0 %v4264_v40 }
 0x1e5   :  { %2793 = vmatprep.subr.bf16.mxu0 %v4272_v41 }
 0x1e8   :  { %2794 = vmatpush2.bf16.msra.mxu0 %v4270_v42 }
 0x1e9   :  { %2795 = vmatprep.subr.bf16.mxu0 %v4278_v43 }
 0x1ec   :  { %2796 = vmatpush2.bf16.msra.mxu0 %v4276_v44 }
 0x1ef   :  { %v2553_v47 = vpop.f32.mrf.mxu0  ;;  %2798 = vmatmul.mubr.bf16.vlgmr.msra.gmra.mxu0 %v187_v46 }
 0x1f0   :  { %v2594_v49 = vpop.f32.mrf.mxu1  ;;  %v2554_v50 = vadd.f32 %v2553_v47, %v4632_v8 }
 0x1f1   :  { %v2555_v52 = vpop.f32.mrf.mxu0 }
 0x1f2   :  { %v2596_v53 = vpop.f32.mrf.mxu1  ;;  %v2556_v54 = vadd.f32 %v2555_v52, %v4634_v48  ;;  %v2595_v55 = vadd.f32 %v2594_v49, %v2554_v50  ;;  %v4282_v48 = vld [vmem:[#allocation10 + $0x30] sm:$0xff]  }
 0x1f3   :  { %v2557_v56 = vpop.f32.mrf.mxu0  ;;  %3674 = vmatpush3.bf16.msra.mxu1 %v4282_v48 }
 0x1f4   :  { %v2598_v57 = vpop.f32.mrf.mxu1  ;;  %v2597_v58 = vadd.f32 %v2596_v53, %v2556_v54  ;;  %3675 = vmatprep.subr.bf16.mxu1 %v4283_v12 }
 0x1f5   :  { %v2558_v59 = vpop.f32.mrf.mxu0 }
 0x1f6   :  { %v2599_v60 = vpop.f32.mrf.mxu1 }
 0x1f7   :  { %3676 = vmatpush3.bf16.msra.mxu1 %v4284_v13 }
 0x1f8   :  { %3677 = vmatprep.subr.bf16.mxu1 %v4285_v14 }
 0x1fb   :  { %3678 = vmatpush3.bf16.msra.mxu1 %v4286_v15 }
 0x1fc   :  { %3679 = vmatprep.subr.bf16.mxu1 %v4287_v16 }
 0x1ff   :  { %3680 = vmatpush3.bf16.msra.mxu1 %v4288_v17 }
 0x200   :  { %3681 = vmatprep.subr.bf16.mxu1 %v4289_v51  ;;  %v4539_v51 = vmov 1966171168  }
 0x203   :  { %3682 = vmatpush3.bf16.msra.mxu1 %v4290_v18  ;;  %v2889_v18 = vunpack.c.l.s4 %v4539_v51 }
 0x204   :  { %3683 = vmatprep.subr.bf16.mxu1 %v4291_v19  ;;  %v2891_v19 = vlaneseq }
 0x207   :  { %3684 = vmatpush3.bf16.msra.mxu1 %v4292_v20  ;;  %v2890_v20 = vunpack.c.0.s8 %v2889_v18 }
 0x208   :  { %3685 = vmatprep.subr.bf16.mxu1 %v4293_v23 }
 0x20b   :  { %3686 = vmatpush3.bf16.msra.mxu1 %v4294_v28 }
 0x22f   :  { %v2635_v61 = vpop.f32.mrf.mxu0 }
 0x230   :  { %v2676_v62 = vpop.f32.mrf.mxu1  ;;  %v2636_v63 = vadd.f32 %v2635_v61, %v2595_v55 }
 0x231   :  { %v2637_v0 = vpop.f32.mrf.mxu0 }
 0x232   :  { %v2678_v1 = vpop.f32.mrf.mxu1  ;;  %v2638_v2 = vadd.f32 %v2637_v0, %v2597_v58  ;;  %v2677_v3 = vadd.f32 %v2676_v62, %v2636_v63 }
 0x233   :  { %v2639_v4 = vpop.f32.mrf.mxu0 }
 0x234   :  { %v2680_v5 = vpop.f32.mrf.mxu1  ;;  %v2679_v6 = vadd.f32 %v2678_v1, %v2638_v2 }
 0x235   :  { %v2640_v7 = vpop.f32.mrf.mxu0 }
 0x236   :  { %v2681_v8 = vpop.f32.mrf.mxu1 }
 0x26f   :  { %v2717_v21 = vpop.f32.mrf.mxu0 }
 0x270   :  { %v2758_v22 = vpop.f32.mrf.mxu1  ;;  %v2718_v24 = vadd.f32 %v2717_v21, %v2677_v3  ;;  %v2892_v21 = vshrl.u32 %v2891_v19, 7 }
 0x271   :  { %v2719_v25 = vpop.f32.mrf.mxu0 }
 0x272   :  { %v2760_v26 = vpop.f32.mrf.mxu1  ;;  %v2759_v27 = vadd.f32 %v2758_v22, %v2718_v24  ;;  %v2720_v37 = vadd.f32 %v2719_v25, %v2679_v6  ;;  %v2893_v23 = vsub.s32 %v2890_v20, %v2892_v21 }
 0x273   :  { %v2721_v29 = vpop.f32.mrf.mxu0 }
 0x274   :  { %v2762_v30 = vpop.f32.mrf.mxu1  ;;  %v2761_v39 = vadd.f32 %v2760_v26, %v2720_v37  ;;  %v4639_v29 = vsub.s32 0, %v2892_v21 }
 0x275   :  { %v2722_v31 = vpop.f32.mrf.mxu0  ;;  %v2911_v30 = vsub.s32 1, %v2892_v21 }
 0x276   :  { %v2763_v32 = vpop.f32.mrf.mxu1  ;;  %v2848_v31 = vld [vmem:[#allocation8] sm:$0x3] }
 0x280   :  { %v2840_v33 = vpop.f32.mrf.mxu1 }
 0x282   :  { %v2842_v34 = vpop.f32.mrf.mxu1 }
 0x284   :  { %v2844_v35 = vpop.f32.mrf.mxu1 }
 0x285   :  { %v2925_v35 = vrot.slane %v2848_v31, %v2911_v30 }
 0x286   :  { %v2845_v36 = vpop.f32.mrf.mxu1 }
 0x2af   :  { %v2799_v38 = vpop.f32.mrf.mxu0 }
 0x2b0   :  { %v2800_v40 = vadd.f32 %v2799_v38, %v2759_v27  ;;  %v2847_v27 = vld [vmem:[#allocation7] sm:$0x3] }
 0x2b1   :  { %v2801_v41 = vpop.f32.mrf.mxu0 }
 0x2b2   :  { %v2841_v42 = vadd.f32 %v2840_v33, %v2800_v40  ;;  %v2802_v43 = vadd.f32 %v2801_v41, %v2761_v39 }
 0x2b3   :  { %v2803_v44 = vpop.f32.mrf.mxu0 }
 0x2b4   :  { %v2849_v45 = vrot.slane %v2841_v42, 4  ;;  %v2843_v46 = vadd.f32 %v2842_v34, %v2802_v43  ;;  %v2921_v34 = vrot.slane %v2848_v31, %v4639_v29 }
 0x2b5   :  { %v2804_v47 = vpop.f32.mrf.mxu0 }
 0x2b6   :  { %v2850_v49 = vadd.f32 %v2849_v45, %v2841_v42  ;;  %v2855_v50 = vrot.slane %v2843_v46, 4  ;;  %v4295_v45 = vld [vmem:[#allocation14 + $0x38] sm:$0xff]   ;;  %v4296_v47 = vld [vmem:[#allocation14 + $0x30] sm:$0xff]  }
 0x2b8   :  { %v2851_v52 = vrot.slane %v2850_v49, 2  ;;  %v2856_v53 = vadd.f32 %v2855_v50, %v2843_v46  ;;  %v4298_v50 = vld [vmem:[#allocation14 + $0x20] sm:$0xff]  }
 0x2ba   :  { %v2852_v54 = vadd.f32 %v2851_v52, %v2850_v49  ;;  %v2857_v55 = vrot.slane %v2856_v53, 2  ;;  %v4297_v49 = vld [vmem:[#allocation14 + $0x28] sm:$0xff]   ;;  %v4299_v52 = vld [vmem:[#allocation14 + $0x18] sm:$0xff]  }
 0x2bc   :  { %v2853_v56 = vrot.slane %v2852_v54, 1  ;;  %v2858_v57 = vadd.f32 %v2857_v55, %v2856_v53  ;;  %v4300_v53 = vld [vmem:[#allocation14 + $0x10] sm:$0xff]   ;;  %v4302_v55 = vld [vmem:[#allocation14] sm:$0xff]  }
 0x2be   :  { %v2854_v58 = vadd.f32 %v2853_v56, %v2852_v54  ;;  %v2859_v59 = vrot.slane %v2858_v57, 1  ;;  %v4301_v54 = vld [vmem:[#allocation14 + $0x8] sm:$0xff]  }
 0x2c0   :  { %v2861_v60 = vmul.f32 0.125, %v2854_v58  ;;  %v2860_v61 = vadd.f32 %v2859_v59, %v2858_v57 }
 0x2c2   :  { %v2863_v62 = vsub.f32 %v2841_v42, %v2861_v60  ;;  %v2862_v63 = vmul.f32 0.125, %v2860_v61 }
 0x2c4   :  { %v2865_v0 = vmul.f32 %v2863_v62, %v2863_v62  ;;  %v2864_v1 = vsub.f32 %v2843_v46, %v2862_v63  ;;  %v4540_v46 = vmov 0.0  }
 0x2c5   :  { %3702 = vmatprep.subr.bf16.mxu1 %v4540_v46 }
 0x2c6   :  { %v2867_v2 = vrot.slane %v2865_v0, 4  ;;  %v2866_v3 = vmul.f32 %v2864_v1, %v2864_v1 }
 0x2c8   :  { %v2868_v4 = vadd.f32 %v2867_v2, %v2865_v0  ;;  %v2873_v5 = vrot.slane %v2866_v3, 4 }
 0x2ca   :  { %v2869_v6 = vrot.slane %v2868_v4, 2  ;;  %v2874_v7 = vadd.f32 %v2873_v5, %v2866_v3 }
 0x2cc   :  { %v2870_v8 = vadd.f32 %v2869_v6, %v2868_v4  ;;  %v2875_v9 = vrot.slane %v2874_v7, 2 }
 0x2ce   :  { %v2871_v10 = vrot.slane %v2870_v8, 1  ;;  %v2876_v11 = vadd.f32 %v2875_v9, %v2874_v7 }
 0x2d0   :  { %v2872_v48 = vadd.f32 %v2871_v10, %v2870_v8  ;;  %v2877_v12 = vrot.slane %v2876_v11, 1 }
 0x2d2   :  { %v2879_v13 = vmul.f32 0.125, %v2872_v48  ;;  %v2878_v14 = vadd.f32 %v2877_v12, %v2876_v11 }
 0x2d4   :  { %v2881_v15 = vadd.f32 1e-05, %v2879_v13  ;;  %v2880_v16 = vmul.f32 0.125, %v2878_v14  ;;  %v3102_v13 = vld [vmem:[#allocation11] sm:$0x1] }
 0x2d6   :  { %v2882_v17 = vadd.f32 1e-05, %v2880_v16  ;;  %4303 = vrsqrt.f32 %v2881_v15 }
 0x2d8   :  { %4305 = vrsqrt.f32 %v2882_v17  ;;  %v3661_v17 = vld [vmem:[#allocation13] ss:$0 sm:$0xff] }
 0x2e3   :  { %v4304_v22 = vpop.eup %4303 }
 0x2e5   :  { %v4306_v24 = vpop.eup %4305 }
 0x2e6   :  { %v2887_v25 = vcombine.low %v4304_v22, %v4306_v24  ;;  %v3251_v22 = vand.u32 127, %v2891_v19 }
 0x2e8   :  { %v2894_v26 = vrot.slane %v2887_v25, %v2893_v23  ;;  %vm3252_vm3 = vcmp.lt.s32.totalorder %v3251_v22, 50 }
 0x2ea   :  { %v2901_v28 = vrot.slane %v2894_v26, %v2893_v23  ;;  %v3662_v23 = vld [vmem:[#allocation16] ss:$0 sm:$0xff] }
 0x2ec   :  { %v2903_v32 = vmul.f32 %v2901_v28, %v2847_v27 }
 0x2ee   :  { %v2912_v33 = vrot.slane %v2903_v32, %v2911_v30  ;;  %v2908_v36 = vrot.slane %v2903_v32, %v4639_v29 }
 0x2f0   :  { %v2916_v37 = vmul.f32 %v2912_v33, %v2864_v1  ;;  %v2915_v38 = vmul.f32 %v2908_v36, %v2863_v62 }
 0x2f2   :  { %v2929_v39 = vadd.f32 %v2925_v35, %v2916_v37  ;;  %v2928_v40 = vadd.f32 %v2921_v34, %v2915_v38 }
 0x2f4   :  { %v2931_v41 = vmax.f32 %v2929_v39, 0.0  ;;  %v2930_v42 = vmax.f32 %v2928_v40, 0.0 }
 0x2f6   :  { %v2933_v43 = vpack.c.bf16 %v2931_v41, %v2931_v41  ;;  %v2932_v44 = vpack.c.bf16 %v2930_v42, %v2930_v42 }
 0x2f8   :  { %3094 = vmatprep.mubr.bf16.mxu1 %v2933_v43 }
 0x2f9   :  { %3095 = vmatmul.mubr.bf16.vlgmr.msra.gmra.mxu1 %v2932_v44 }
 0x2fa   :  { %3703 = vmatpush3.bf16.msra.mxu1 %v4295_v45  ;;  %3718 = vmatprep.mubr.msk.bf16.mxu1 %vm4541_vm2, %v4540_v46 }
 0x2fb   :  { %3704 = vmatprep.subr.bf16.mxu1 %v4540_v46 }
 0x2fe   :  { %3705 = vmatpush3.bf16.msra.mxu1 %v4296_v47 }
 0x2ff   :  { %3706 = vmatprep.subr.bf16.mxu1 %v4540_v46 }
 0x302   :  { %3707 = vmatpush3.bf16.msra.mxu1 %v4297_v49 }
 0x303   :  { %3708 = vmatprep.subr.bf16.mxu1 %v4540_v46 }
 0x306   :  { %3709 = vmatpush3.bf16.msra.mxu1 %v4298_v50 }
 0x307   :  { %3710 = vmatprep.subr.bf16.mxu1 %v4540_v46 }
 0x30a   :  { %3711 = vmatpush3.bf16.msra.mxu1 %v4299_v52 }
 0x30b   :  { %3712 = vmatprep.subr.bf16.mxu1 %v4540_v46 }
 0x30e   :  { %3713 = vmatpush3.bf16.msra.mxu1 %v4300_v53 }
 0x30f   :  { %3714 = vmatprep.subr.bf16.mxu1 %v4540_v46 }
 0x312   :  { %3715 = vmatpush3.bf16.msra.mxu1 %v4301_v54 }
 0x313   :  { %3716 = vmatprep.subr.bf16.mxu1 %v4540_v46 }
 0x316   :  { %3717 = vmatpush3.bf16.msra.mxu1 %v4302_v55 }
 0x3b9   :  { %v3687_v56 = vpop.f32.mrf.mxu1 }
 0x3bb   :  { %v3688_v57 = vpop.f32.mrf.mxu1 }
 0x3bc   :  { %v3689_v58 = vadd.f32 %v3688_v57, %v3687_v56 }
 0x3bd   :  { %v3690_v59 = vpop.f32.mrf.mxu1 }
 0x3be   :  { %v3104_v60 = vrot.slane %v3689_v58, 4 }
 0x3bf   :  { %v3691_v61 = vpop.f32.mrf.mxu1 }
 0x3c0   :  { %v3105_v62 = vadd.f32 %v3689_v58, %v3104_v60 }
 0x3c2   :  { %v3106_v63 = vrot.slane %v3105_v62, 2 }
 0x3c4   :  { %v3107_v0 = vadd.f32 %v3106_v63, %v3105_v62 }
 0x3c6   :  { %v3108_v1 = vrot.slane %v3107_v0, 1 }
 0x3c8   :  { %v3109_v2 = vadd.f32 %v3108_v1, %v3107_v0 }
 0x3ca   :  { %v3110_v3 = vmul.f32 0.125, %v3109_v2 }
 0x3cc   :  { %v3111_v4 = vsub.f32 %v3689_v58, %v3110_v3 }
 0x3ce   :  { %v3112_v5 = vmul.f32 %v3111_v4, %v3111_v4 }
 0x3d0   :  { %v3113_v6 = vrot.slane %v3112_v5, 4 }
 0x3d2   :  { %v3114_v7 = vadd.f32 %v3113_v6, %v3112_v5 }
 0x3d4   :  { %v3115_v8 = vrot.slane %v3114_v7, 2 }
 0x3d6   :  { %v3116_v9 = vadd.f32 %v3115_v8, %v3114_v7 }
 0x3d8   :  { %v3117_v10 = vrot.slane %v3116_v9, 1 }
 0x3da   :  { %v3118_v11 = vadd.f32 %v3117_v10, %v3116_v9 }
 0x3dc   :  { %v3119_v48 = vmul.f32 0.125, %v3118_v11 }
 0x3de   :  { %v3120_v12 = vadd.f32 1e-05, %v3119_v48 }
 0x3e0   :  { %4307 = vrsqrt.f32 %v3120_v12 }
 0x3ed   :  { %v4308_v14 = vpop.eup %4307 }
 0x3ee   :  { %v3122_v15 = vmul.f32 %v4308_v14, %v3102_v13 }
 0x3f0   :  { %v3127_v16 = vrot.slane %v3122_v15, %v4639_v29 }
 0x3f2   :  { %v3129_v51 = vmul.f32 %v3127_v16, %v3111_v4 }
 0x3f4   :  { %v3136_v18 = vadd.f32 %v3661_v17, %v3129_v51 }
 0x3f6   :  { %v3137_v20 = vmax.f32 %v3136_v18, 0.0 }
 0x3f8   :  { %v3138_v21 = vpack.c.bf16 %v3137_v20, %v3137_v20 }
 0x3fa   :  { %3719 = vmatmul.mubr.bf16.vlgmr.msra.gmra.mxu1 %v3138_v21 }
 0x4ba   :  { %v3244_v24 = vpop.f32.mrf.mxu1 }
 0x4bb   :  { %v3245_v25 = vadd.f32 %v3662_v23, %v3244_v24 }
 0x4bc   :  { %v3720_v26 = vpop.f32.mrf.mxu1 }
 0x4bd   :  { %v3253_v27 = vsel %vm3252_vm3, %v3245_v25, -1e+30 }
 0x4be   :  { %3254 = vmax.xlane.f32.xlu0 %v3253_v27  ;;  %v3247_v28 = vpop.f32.mrf.mxu1 }
 0x4c0   :  { %v3721_v30 = vpop.f32.mrf.mxu1 }
 0x547   :  { %v3255_v31 = vpop.xlane.xlu0 %3254 }
 0x548   :  { %v3256_v32 = vsub.f32 %v3253_v27, %v3255_v31 }
 0x54a   :  { %v3257_v29 = vmul.f32 1.442695, %v3256_v32 }
 0x54c   :  { %4309 = vpow2.f32 %v3257_v29 }
 0x559   :  { %v4310_v33 = vpop.eup %4309 }
 0x55a   :  { %3259 = vadd.xlane.f32.xlu0 %v4310_v33 }
 0x5e3   :  { %v3260_v34 = vpop.xlane.xlu0 %3259 }
 0x5e4   :  { %4311 = vrcp.f32 %v3260_v34 }
 0x5f1   :  { %v4312_v19 = vpop.eup %4311 }
 0x5f2   :  { %v3262_v35 = vmul.f32 %v4312_v19, %v4310_v33 }
 0x5f4   :  { %3263 = vst [vmem:[#allocation17] sm:$0xff] %v3262_v35 }
 0x5f5   :  { %4504 = shalt.err (!%p4501_p7)
}
 0x5f6   :  { %3273 = dma.vmem_to_hbm [thread:$0]  %s3271_s8, 128, %s4657_s9, [#allocation4]  }
 0x5f7   :  { %4523 = dma.done.wait [#allocation4], 128  }
 0x5f8   :  { %4524 = vsyncadd [#allocation4], 4294967168 }
 0x5f9   :  { %3277 = vsyncpa [#allocation3], 1 }
 0x5fa   :  { %3278 = vsyncpa [#allocation6], 1 }
 0x5fb   :  { %3279 = vsyncpa [#allocation9], 1 }
 0x5fc   :  { %3280 = vsyncpa [#allocation12], 1 }
 0x5fd   :  { %3281 = vsyncpa [#allocation15], 1 }
 0x5fe   :  { %3282 = vsyncpa [#allocation4], 1 }

</bundles_post_ra>
